<compile_context>
chip_gen: v6e
topology: v6e:2x2x1
jax: 0.10.0
libtpu: 0.0.40
codegen_flags: <defaults>
</compile_context>

<pallas_src>
import functools

import jax
import jax.numpy as jnp
from jax import lax
from jax.experimental import pallas as pl
from jax.experimental.pallas import tpu as pltpu

LANE = 128          # all channel dims zero-padded to this
NEG_INF = -1e30     # finite, so masked rows never produce inf-inf NaNs


def _round_up(v, m):
    return (v + m - 1) // m * m


def _hw_vmem_bytes():
    try:
        info = pltpu.get_tpu_info()
    except Exception:
        return None
    for name in ("vmem_capacity_bytes", "vmem_size_bytes", "vmem_bytes"):
        v = getattr(info, name, None)
        if isinstance(v, int) and v > 0:
            return v
    return None


def _hw_config():
    """(vmem_limit_bytes, row_tile) per TPU generation."""
    vmem = _hw_vmem_bytes()
    if vmem is not None and vmem >= 128 * 1024 * 1024:   # v5e / v6e: 128 MiB VMEM
        return 96 * 1024 * 1024, 512
    # v7x (64 MiB / TC) or unknown: leave headroom for double buffers + scratch
    return 48 * 1024 * 1024, 256


VMEM_LIMIT, ROW_TILE = _hw_config()


def _pad_rows(n):
    """Padded node count and row tile (tile divides padded count, multiple of 8)."""
    if n <= ROW_TILE:
        n_p = max(8, _round_up(n, 8))
        return n_p, n_p
    return _round_up(n, ROW_TILE), ROW_TILE


# -----------------------------------------------------------------------------
# Kernel 1: feature transform (+ optional fused BN affine + ReLU on the input)
#   h = act(x) @ W ; a_dst[i] = <h_i, att_dst> ; a_src[i] = <h_i, att_src>
# -----------------------------------------------------------------------------
def _transform_kernel(x_ref, w_ref, asrc_ref, adst_ref, scale_ref, shift_ref,
                      h_ref, ad_ref, as_ref, *, apply_affine):
    x = x_ref[...].astype(jnp.float32)                               # bf16 or f32 input
    if apply_affine:                                                 # fused BN affine + ReLU
        x = jnp.maximum(x * scale_ref[...] + shift_ref[...], 0.0)
    h = jnp.dot(x.astype(jnp.bfloat16), w_ref[...],
                preferred_element_type=jnp.float32)                  # [TM, C] f32 (MXU bf16)
    # per-node attention logits: VPU/XLU reductions, no degenerate [TM,C]x[C,1] matmuls
    # TODO(synk): (TM, 1) logit outputs still lower to masked stores; negligible bytes.
    ad_ref[...] = jnp.sum(h * adst_ref[...], axis=-1, keepdims=True)  # [TM, 1]
    as_ref[...] = jnp.sum(h * asrc_ref[...], axis=-1, keepdims=True)  # [TM, 1]
    h_ref[...] = h.astype(jnp.bfloat16)


def _gat_transform(x, w, a_src, a_dst, scale, shift, *, tm):
    n_p = x.shape[0]
    c_in = x.shape[1]
    c_out = w.shape[1]
    apply_affine = scale is not None
    if not apply_affine:
        scale = jnp.ones((1, c_out), jnp.float32)
        shift = jnp.zeros((1, c_out), jnp.float32)
    return pl.pallas_call(
        functools.partial(_transform_kernel, apply_affine=apply_affine),
        grid=(n_p // tm,),
        in_specs=[
            pl.BlockSpec((tm, c_in), lambda i: (i, 0)),
            pl.BlockSpec((c_in, c_out), lambda i: (0, 0)),
            pl.BlockSpec((1, c_out), lambda i: (0, 0)),
            pl.BlockSpec((1, c_out), lambda i: (0, 0)),
            pl.BlockSpec((1, c_out), lambda i: (0, 0)),
            pl.BlockSpec((1, c_out), lambda i: (0, 0)),
        ],
        out_specs=[
            pl.BlockSpec((tm, c_out), lambda i: (i, 0)),
            pl.BlockSpec((tm, 1), lambda i: (i, 0)),
            pl.BlockSpec((tm, 1), lambda i: (i, 0)),
        ],
        out_shape=[
            jax.ShapeDtypeStruct((n_p, c_out), jnp.bfloat16),
            jax.ShapeDtypeStruct((n_p, 1), jnp.float32),
            jax.ShapeDtypeStruct((n_p, 1), jnp.float32),
        ],
        compiler_params=pltpu.CompilerParams(
            dimension_semantics=("parallel",), vmem_limit_bytes=VMEM_LIMIT),
    )(x, w, a_src, a_dst, scale, shift)


# -----------------------------------------------------------------------------
# Kernel 2: flash-style attention + aggregation + fused BN batch-stat partials
#   grid = (dst row tiles  [parallel],  src column tiles  [arbitrary, trailing])
# -----------------------------------------------------------------------------
def _gat_attn_kernel(h_ref, mask_ref, ev_ref, ad_ref, as_ref, cedge_ref, b_ref, rmask_ref,
                     o_ref, bnsum_ref, bnsq_ref, m_sc, l_sc, acc_sc):
    k = pl.program_id(1)

    @pl.when(k == 0)
    def _():
        m_sc[...] = jnp.full_like(m_sc, -jnp.inf)
        l_sc[...] = jnp.zeros_like(l_sc)
        acc_sc[...] = jnp.zeros_like(acc_sc)

    c_e = cedge_ref[0, 0]                                            # SMEM scalar
    # logits[i, j] = a_dst[i] + a_src[j] + c_edge * edge_attr[i, j]
    s = ad_ref[...] + as_ref[...] + c_e * ev_ref[...].astype(jnp.float32)   # [TM, TK]
    s = jnp.maximum(s, jnp.float32(0.2) * s)                         # leaky_relu, slope<1
    s = jnp.where(mask_ref[...] != 0, s, NEG_INF)                    # int8 {0,1} edge mask

    m_prev = m_sc[...]
    m_new = jnp.maximum(m_prev, jnp.max(s, axis=-1, keepdims=True))
    alpha = jnp.exp(m_prev - m_new)
    p = jnp.exp(s - m_new)                                           # masked entries -> 0
    l_sc[...] = alpha * l_sc[...] + jnp.sum(p, axis=-1, keepdims=True)
    acc_sc[...] = alpha * acc_sc[...] + jnp.dot(
        p.astype(jnp.bfloat16), h_ref[...], preferred_element_type=jnp.float32)
    m_sc[...] = m_new

    @pl.when(k == pl.num_programs(1) - 1)
    def _():
        # deferred softmax normalization: one (TM, C) scale instead of per-step (TM, TK)
        out = acc_sc[...] * pl.reciprocal(l_sc[...], approx=True) + b_ref[...]
        o_ref[...] = out.astype(jnp.bfloat16)
        # BatchNorm batch-statistic partials (padded rows zeroed out), free under the MXU
        y = out * rmask_ref[...]
        bnsum_ref[...] = jnp.sum(y, axis=0, keepdims=True)
        bnsq_ref[...] = jnp.sum(y * y, axis=0, keepdims=True)


def _gat_attention(h, a_d, a_s_row, mask, ev, c_edge, bias, row_mask, *, tm, tk):
    n_p, c = h.shape
    n_row = n_p // tm
    return pl.pallas_call(
        _gat_attn_kernel,
        grid=(n_row, n_p // tk),
        in_specs=[
            pl.BlockSpec((tk, c), lambda i, k: (k, 0)),              # h (source rows)
            pl.BlockSpec((tm, tk), lambda i, k: (i, k)),             # int8 adjacency mask
            pl.BlockSpec((tm, tk), lambda i, k: (i, k)),             # bf16 edge attrs
            pl.BlockSpec((tm, 1), lambda i, k: (i, 0)),              # a_dst logits
            pl.BlockSpec((1, tk), lambda i, k: (0, k)),              # a_src logits (row)
            pl.BlockSpec(memory_space=pltpu.MemorySpace.SMEM),       # c_edge scalar
            pl.BlockSpec((1, c), lambda i, k: (0, 0)),               # GAT output bias
            pl.BlockSpec((tm, 1), lambda i, k: (i, 0)),              # row validity (BN)
        ],
        out_specs=[
            pl.BlockSpec((tm, c), lambda i, k: (i, 0)),
            pl.BlockSpec((1, c), lambda i, k: (i, 0)),
            pl.BlockSpec((1, c), lambda i, k: (i, 0)),
        ],
        out_shape=[
            jax.ShapeDtypeStruct((n_p, c), jnp.bfloat16),
            jax.ShapeDtypeStruct((n_row, c), jnp.float32),
            jax.ShapeDtypeStruct((n_row, c), jnp.float32),
        ],
        scratch_shapes=[pltpu.VMEM((tm, 1), jnp.float32),            # running max m
                        pltpu.VMEM((tm, 1), jnp.float32),            # running denom l
                        pltpu.VMEM((tm, c), jnp.float32)],           # accumulator
        compiler_params=pltpu.CompilerParams(
            dimension_semantics=("parallel", "arbitrary"),
            vmem_limit_bytes=VMEM_LIMIT),
    )(h, mask, ev, a_d, a_s_row, c_edge, bias, row_mask)


# -----------------------------------------------------------------------------
# BN finalize (tiny (n_tiles, C) partial reduction -> per-channel scale/shift), plain XLA
# -----------------------------------------------------------------------------
def _bn_scale_shift(bn_sum, bn_sq, gamma, beta, n_valid):
    inv_n = jnp.float32(1.0 / float(n_valid))
    mean = jnp.sum(bn_sum, axis=0, keepdims=True) * inv_n
    var = jnp.maximum(jnp.sum(bn_sq, axis=0, keepdims=True) * inv_n - mean * mean, 0.0)
    scale = gamma * lax.rsqrt(var + jnp.float32(1e-5))               # biased var, eps=1e-5
    shift = beta - mean * scale
    return scale, shift


# -----------------------------------------------------------------------------
# Kernel 3: BN2 affine + residual shortcut (+ optional projection) + ReLU
# -----------------------------------------------------------------------------
def _residual_kernel(y_ref, scale_ref, shift_ref, x_ref, *rest, project):
    if project:
        ws_ref, bs_ref, o_ref = rest
    else:
        (o_ref,) = rest
    out = y_ref[...].astype(jnp.float32) * scale_ref[...] + shift_ref[...]
    if project:
        ident = jnp.dot(x_ref[...].astype(jnp.bfloat16), ws_ref[...],
                        preferred_element_type=jnp.float32) + bs_ref[...]
    else:
        ident = x_ref[...].astype(jnp.float32)                       # identity: no matmul
    o_ref[...] = jnp.maximum(out + ident, 0.0).astype(o_ref.dtype)


def _bn_residual_relu(y, scale, shift, x_in, ws, bs, *, tm):
    n_p, c = y.shape
    c_in = x_in.shape[1]
    project = ws is not None
    in_specs = [
        pl.BlockSpec((tm, c), lambda i: (i, 0)),
        pl.BlockSpec((1, c), lambda i: (0, 0)),
        pl.BlockSpec((1, c), lambda i: (0, 0)),
        pl.BlockSpec((tm, c_in), lambda i: (i, 0)),
    ]
    args = [y, scale, shift, x_in]
    if project:
        in_specs += [pl.BlockSpec((c_in, c), lambda i: (0, 0)),
                     pl.BlockSpec((1, c), lambda i: (0, 0))]
        args += [ws, bs]
    return pl.pallas_call(
        functools.partial(_residual_kernel, project=project),
        grid=(n_p // tm,),
        in_specs=in_specs,
        out_specs=pl.BlockSpec((tm, c), lambda i: (i, 0)),
        out_shape=jax.ShapeDtypeStruct((n_p, c), jnp.bfloat16),
        compiler_params=pltpu.CompilerParams(
            dimension_semantics=("parallel",), vmem_limit_bytes=VMEM_LIMIT),
    )(*args)


# -----------------------------------------------------------------------------
# One GraphResNetBlockGAT: GAT1 -> BN -> ReLU -> GAT2 -> BN -> (+shortcut) -> ReLU
# (the single shared bn is applied twice, matching the reference module)
# -----------------------------------------------------------------------------
def gat_block(x, mask, ev, row_mask, n_valid, p, tm, tk):
    # GAT1 (+ fused BN batch-stat partials in the attention epilogue)
    h1, ad1, as1 = _gat_transform(x, p["w1"], p["asrc1"], p["adst1"], None, None, tm=tm)
    y1, s1, q1 = _gat_attention(h1, ad1, as1.reshape(1, -1), mask, ev, p["c1"], p["b1"],
                                row_mask, tm=tm, tk=tk)
    sc1, sh1 = _bn_scale_shift(s1, q1, p["gamma"], p["beta"], n_valid)
    # GAT2 (BN1 affine + ReLU fused into its transform)
    h2, ad2, as2 = _gat_transform(y1, p["w2"], p["asrc2"], p["adst2"], sc1, sh1, tm=tm)
    y2, s2, q2 = _gat_attention(h2, ad2, as2.reshape(1, -1), mask, ev, p["c2"], p["b2"],
                                row_mask, tm=tm, tk=tk)
    sc2, sh2 = _bn_scale_shift(s2, q2, p["gamma"], p["beta"], n_valid)
    # BN2 affine + shortcut + ReLU
    return _bn_residual_relu(y2, sc2, sh2, x, p["ws"], p["bs"], tm=tm)


# -----------------------------------------------------------------------------
# Glue: edge list -> pre-padded dense int8 adjacency mask / bf16 edge attributes
# (GATConv add_self_loops(fill_value='mean') handling); no N^2 f32 intermediates.
# -----------------------------------------------------------------------------
def densify_graph(edge_index, edge_attr, num_nodes, n_pad):
    src = edge_index[0]
    dst = edge_index[1]
    ea = edge_attr[:, 0].astype(jnp.float32)
    non_self = (src != dst)
    nsf = non_self.astype(jnp.float32)

    mask = jnp.zeros((n_pad, n_pad), jnp.int8).at[dst, src].max(non_self.astype(jnp.int8))
    ev = jnp.zeros((n_pad, n_pad), jnp.bfloat16).at[dst, src].add(
        (ea * nsf).astype(jnp.bfloat16))

    # add_self_loops(fill_value='mean'): self-loop attr = mean of incoming edge attrs
    sum_in = jnp.zeros((num_nodes,), jnp.float32).at[dst].add(ea * nsf)
    cnt_in = jnp.zeros((num_nodes,), jnp.float32).at[dst].add(nsf)
    mean_in = jnp.where(cnt_in > 0, sum_in / jnp.maximum(cnt_in, 1.0), 0.0)

    diag = jnp.arange(num_nodes)
    mask = mask.at[diag, diag].set(1)
    ev = ev.at[diag, diag].set(mean_in.astype(jnp.bfloat16))
    return mask, ev


# -----------------------------------------------------------------------------
# Parameter init (shapes follow the PyTorch __init__, zero-padded to 128 lanes)
# -----------------------------------------------------------------------------
def _pad2(a, rows, cols):
    return jnp.zeros((rows, cols), a.dtype).at[:a.shape[0], :a.shape[1]].set(a)


def _init_gat_params(key, c_in, c_out, scale=0.1):
    ks = jax.random.split(key, 5)
    w = scale * jax.random.normal(ks[0], (c_in, c_out), jnp.float32)      # lin_src
    a_src = scale * jax.random.normal(ks[1], (1, c_out), jnp.float32)     # att_src
    a_dst = scale * jax.random.normal(ks[2], (1, c_out), jnp.float32)     # att_dst
    w_edge = scale * jax.random.normal(ks[3], (1, c_out), jnp.float32)    # lin_edge
    a_edge = scale * jax.random.normal(ks[4], (1, c_out), jnp.float32)    # att_edge
    # edge_dim == 1: alpha_edge[i,j] = ev[i,j] * sum_k(w_edge[k] * a_edge[k])
    c_edge = jnp.sum(w_edge * a_edge).reshape(1, 1)
    return dict(
        w=_pad2(w, LANE, LANE).astype(jnp.bfloat16),
        a_src=_pad2(a_src, 1, LANE),
        a_dst=_pad2(a_dst, 1, LANE),
        c_edge=c_edge,
        bias=jnp.zeros((1, LANE), jnp.float32),
    )


def init_block_params(key, c_in, c_out):
    k1, k2, k3 = jax.random.split(key, 3)
    g1 = _init_gat_params(k1, c_in, c_out)
    g2 = _init_gat_params(k2, c_out, c_out)
    if c_in != c_out:   # shortcut Linear only when channel counts differ
        ws = 0.1 * jax.random.normal(k3, (c_in, c_out), jnp.float32)
        ws = _pad2(ws, LANE, LANE).astype(jnp.bfloat16)
        bs = jnp.zeros((1, LANE), jnp.float32)
    else:               # identity shortcut: no weights, no matmul
        ws, bs = None, None
    return dict(
        w1=g1["w"], asrc1=g1["a_src"], adst1=g1["a_dst"], c1=g1["c_edge"], b1=g1["bias"],
        w2=g2["w"], asrc2=g2["a_src"], adst2=g2["a_dst"], c2=g2["c_edge"], b2=g2["bias"],
        gamma=jnp.ones((1, LANE), jnp.float32),    # single shared BatchNorm1d weight
        beta=jnp.zeros((1, LANE), jnp.float32),    # single shared BatchNorm1d bias
        ws=ws, bs=bs,
    )


def init_graph_resnet_gat(key, in_channels, hidden_channels, out_channels, num_layers):
    keys = jax.random.split(key, num_layers)
    params = [init_block_params(keys[0], in_channels, hidden_channels)]
    for i in range(num_layers - 2):
        params.append(init_block_params(keys[i + 1], hidden_channels, hidden_channels))
    params.append(init_block_params(keys[num_layers - 1], hidden_channels, out_channels))
    return params


# -----------------------------------------------------------------------------
# Full forward
# -----------------------------------------------------------------------------
@functools.partial(jax.jit, static_argnames=("out_channels",))
def graph_resnet_gat_forward(x, edge_index, edge_attr, params_list, out_channels):
    n = x.shape[0]
    n_p, tm = _pad_rows(n)
    tk = tm          # source-column tile; n_p is a multiple of both

    mask_p, ev_p = densify_graph(edge_index, edge_attr, n, n_p)

    x_p = jnp.zeros((n_p, LANE), jnp.float32).at[:n, :x.shape[1]].set(x)
    row_mask = (jnp.arange(n_p) < n).astype(jnp.float32).reshape(n_p, 1)

    h = x_p
    for p in params_list:
        h = gat_block(h, mask_p, ev_p, row_mask, n, p, tm, tk)
    return h[:n, :out_channels].astype(jnp.float32)


# -----------------------------------------------------------------------------
if __name__ == "__main__":
    key = jax.random.PRNGKey(0)
    kx, ke, kp = jax.random.split(key, 3)

    # small graph: 8 nodes, bidirectional ring -> 16 directed edges
    N = 8
    IN_CH, HID_CH, OUT_CH, NUM_LAYERS = 4, 32, 16, 3

    x = jax.random.normal(kx, (N, IN_CH), jnp.float32)
    src = jnp.arange(N, dtype=jnp.int32)
    dst = (src + 1) % N
    edge_index = jnp.concatenate(
        [jnp.stack([src, dst], axis=0), jnp.stack([dst, src], axis=0)], axis=1
    )  # [2, 16]
    edge_attr = jax.random.normal(ke, (edge_index.shape[1], 1), jnp.float32)

    params = init_graph_resnet_gat(kp, IN_CH, HID_CH, OUT_CH, NUM_LAYERS)

    out = graph_resnet_gat_forward(x, edge_index, edge_attr, params, out_channels=OUT_CH)
    out = jax.block_until_ready(out)
    assert out.shape == (N, OUT_CH) and out.dtype == jnp.float32
    assert bool(jnp.all(jnp.isfinite(out)))
    print("KERNEL_OK")
</pallas_src>

<mosaic_0001>
module attributes {stable_mosaic.version = 11 : i64} {
  func.func private @main(%arg0: i32) attributes {dimension_semantics = [#tpu.dimension_semantics<core_parallel>], iteration_bounds = array<i64: 2>, tpu.core_type = #tpu.core_type<sc_scalar_subcore>, window_params = []} {
    return
  }
}

module attributes {stable_mosaic.version = 11 : i64} {
  func.func private @main(%arg0: i32) attributes {dimension_semantics = [#tpu.dimension_semantics<core_parallel>], iteration_bounds = array<i64: 2>, tpu.core_type = #tpu.core_type<sc_scalar_subcore>, window_params = []} {
    return
  }
}

module attributes {stable_mosaic.version = 11 : i64} {
  func.func @_transform_kernel(%arg0: i32, %arg1: memref<8x128xf32, #tpu.memory_space<vmem>>, %arg2: memref<128x128xbf16, #tpu.memory_space<vmem>>, %arg3: memref<1x128xf32, #tpu.memory_space<vmem>>, %arg4: memref<1x128xf32, #tpu.memory_space<vmem>>, %arg5: memref<1x128xf32, #tpu.memory_space<vmem>>, %arg6: memref<1x128xf32, #tpu.memory_space<vmem>>, %arg7: memref<8x128xbf16, #tpu.memory_space<vmem>>, %arg8: memref<8x1xf32, #tpu.memory_space<vmem>>, %arg9: memref<8x1xf32, #tpu.memory_space<vmem>>) attributes {dimension_semantics = [#tpu.dimension_semantics<parallel>], iteration_bounds = array<i64: 1>, scalar_prefetch = 0 : i64, scratch_operands = 0 : i64, tpu.core_type = #tpu.core_type<tc>, window_params = [{transform_indices = @transform_0, window_bounds = array<i64: 8, 128>}, {pipeline_mode = #tpu.pipeline_mode<synchronous>, transform_indices = @transform_1, window_bounds = array<i64: 128, 128>}, {pipeline_mode = #tpu.pipeline_mode<synchronous>, transform_indices = @transform_2, window_bounds = array<i64: 1, 128>}, {pipeline_mode = #tpu.pipeline_mode<synchronous>, transform_indices = @transform_3, window_bounds = array<i64: 1, 128>}, {pipeline_mode = #tpu.pipeline_mode<synchronous>, transform_indices = @transform_4, window_bounds = array<i64: 1, 128>}, {pipeline_mode = #tpu.pipeline_mode<synchronous>, transform_indices = @transform_5, window_bounds = array<i64: 1, 128>}, {transform_indices = @transform_6, window_bounds = array<i64: 8, 128>}, {transform_indices = @transform_7, window_bounds = array<i64: 8, 1>}, {transform_indices = @transform_8, window_bounds = array<i64: 8, 1>}]} {
    %c0 = arith.constant 0 : index
    %c0_0 = arith.constant 0 : index
    %0 = vector.load %arg1[%c0, %c0_0] : memref<8x128xf32, #tpu.memory_space<vmem>>, vector<8x128xf32>
    %1 = arith.truncf %0 : vector<8x128xf32> to vector<8x128xbf16>
    %c0_1 = arith.constant 0 : index
    %c0_2 = arith.constant 0 : index
    %2 = vector.load %arg2[%c0_1, %c0_2] : memref<128x128xbf16, #tpu.memory_space<vmem>>, vector<128x128xbf16>
    %cst = arith.constant dense<0.000000e+00> : vector<8x128xf32>
    %3 = tpu.matmul %1, %2, %cst {dimension_numbers = #tpu.dot_dimension_numbers<[1], [0], [0], [1], [0, 0, 1, 1], [], []>} : vector<8x128xbf16>, vector<128x128xbf16>, vector<8x128xf32> -> vector<8x128xf32>
    %c0_3 = arith.constant 0 : index
    %c0_4 = arith.constant 0 : index
    %4 = vector.load %arg4[%c0_3, %c0_4] : memref<1x128xf32, #tpu.memory_space<vmem>>, vector<1x128xf32>
    %5 = vector.broadcast %4 : vector<1x128xf32> to vector<8x128xf32>
    %6 = arith.mulf %3, %5 : vector<8x128xf32>
    %cst_5 = arith.constant dense<0.000000e+00> : vector<8xf32>
    %7 = vector.multi_reduction <add>, %6, %cst_5 [1] : vector<8x128xf32> to vector<8xf32>
    %8 = vector.shape_cast %7 : vector<8xf32> to vector<8x1xf32>
    %c0_6 = arith.constant 0 : index
    %c0_7 = arith.constant 0 : index
    %9 = vector.load %arg8[%c0_6, %c0_7] : memref<8x1xf32, #tpu.memory_space<vmem>>, vector<8x1xf32>
    tpu.vector_store %arg8[%c0_6, %c0_7], %8 {strides = array<i32>} : memref<8x1xf32, #tpu.memory_space<vmem>>, vector<8x1xf32>,
    %c0_8 = arith.constant 0 : index
    %c0_9 = arith.constant 0 : index
    %10 = vector.load %arg3[%c0_8, %c0_9] : memref<1x128xf32, #tpu.memory_space<vmem>>, vector<1x128xf32>
    %11 = vector.broadcast %10 : vector<1x128xf32> to vector<8x128xf32>
    %12 = arith.mulf %3, %11 : vector<8x128xf32>
    %cst_10 = arith.constant dense<0.000000e+00> : vector<8xf32>
    %13 = vector.multi_reduction <add>, %12, %cst_10 [1] : vector<8x128xf32> to vector<8xf32>
    %14 = vector.shape_cast %13 : vector<8xf32> to vector<8x1xf32>
    %c0_11 = arith.constant 0 : index
    %c0_12 = arith.constant 0 : index
    %15 = vector.load %arg9[%c0_11, %c0_12] : memref<8x1xf32, #tpu.memory_space<vmem>>, vector<8x1xf32>
    tpu.vector_store %arg9[%c0_11, %c0_12], %14 {strides = array<i32>} : memref<8x1xf32, #tpu.memory_space<vmem>>, vector<8x1xf32>,
    %16 = arith.truncf %3 : vector<8x128xf32> to vector<8x128xbf16>
    %c0_13 = arith.constant 0 : index
    %c0_14 = arith.constant 0 : index
    %17 = vector.load %arg7[%c0_13, %c0_14] : memref<8x128xbf16, #tpu.memory_space<vmem>>, vector<8x128xbf16>
    tpu.vector_store %arg7[%c0_13, %c0_14], %16 {strides = array<i32>} : memref<8x128xbf16, #tpu.memory_space<vmem>>, vector<8x128xbf16>,
    return
  }
  func.func @transform_0(%arg0: i32) -> (i32, i32) {
    %c0_i32 = arith.constant 0 : i32
    %c0_i32_0 = arith.constant 0 : i32
    return %arg0, %c0_i32 : i32, i32
  }
  func.func @transform_1(%arg0: i32) -> (i32, i32) {
    %c0_i32 = arith.constant 0 : i32
    %c0_i32_0 = arith.constant 0 : i32
    %c0_i32_1 = arith.constant 0 : i32
    return %c0_i32, %c0_i32_0 : i32, i32
  }
  func.func @transform_2(%arg0: i32) -> (i32, i32) {
    %c0_i32 = arith.constant 0 : i32
    %c0_i32_0 = arith.constant 0 : i32
    %c0_i32_1 = arith.constant 0 : i32
    return %c0_i32, %c0_i32_0 : i32, i32
  }
  func.func @transform_3(%arg0: i32) -> (i32, i32) {
    %c0_i32 = arith.constant 0 : i32
    %c0_i32_0 = arith.constant 0 : i32
    %c0_i32_1 = arith.constant 0 : i32
    return %c0_i32, %c0_i32_0 : i32, i32
  }
  func.func @transform_4(%arg0: i32) -> (i32, i32) {
    %c0_i32 = arith.constant 0 : i32
    %c0_i32_0 = arith.constant 0 : i32
    %c0_i32_1 = arith.constant 0 : i32
    return %c0_i32, %c0_i32_0 : i32, i32
  }
  func.func @transform_5(%arg0: i32) -> (i32, i32) {
    %c0_i32 = arith.constant 0 : i32
    %c0_i32_0 = arith.constant 0 : i32
    %c0_i32_1 = arith.constant 0 : i32
    return %c0_i32, %c0_i32_0 : i32, i32
  }
  func.func @transform_6(%arg0: i32) -> (i32, i32) {
    %c0_i32 = arith.constant 0 : i32
    %c0_i32_0 = arith.constant 0 : i32
    return %arg0, %c0_i32 : i32, i32
  }
  func.func @transform_7(%arg0: i32) -> (i32, i32) {
    %c0_i32 = arith.constant 0 : i32
    %c0_i32_0 = arith.constant 0 : i32
    return %arg0, %c0_i32 : i32, i32
  }
  func.func @transform_8(%arg0: i32) -> (i32, i32) {
    %c0_i32 = arith.constant 0 : i32
    %c0_i32_0 = arith.constant 0 : i32
    return %arg0, %c0_i32 : i32, i32
  }
}

module attributes {stable_mosaic.version = 11 : i64} {
  func.func @_gat_attn_kernel(%arg0: i32, %arg1: i32, %arg2: memref<8x128xbf16, #tpu.memory_space<vmem>>, %arg3: memref<8x8xi8, #tpu.memory_space<vmem>>, %arg4: memref<8x8xbf16, #tpu.memory_space<vmem>>, %arg5: memref<8x1xf32, #tpu.memory_space<vmem>>, %arg6: memref<1x8xf32, #tpu.memory_space<vmem>>, %arg7: memref<1x1xf32, #tpu.memory_space<smem>>, %arg8: memref<1x128xf32, #tpu.memory_space<vmem>>, %arg9: memref<8x1xf32, #tpu.memory_space<vmem>>, %arg10: memref<8x128xbf16, #tpu.memory_space<vmem>>, %arg11: memref<1x128xf32, #tpu.memory_space<vmem>>, %arg12: memref<1x128xf32, #tpu.memory_space<vmem>>, %arg13: memref<8x1xf32, #tpu.memory_space<vmem>>, %arg14: memref<8x1xf32, #tpu.memory_space<vmem>>, %arg15: memref<8x128xf32, #tpu.memory_space<vmem>>) attributes {dimension_semantics = [#tpu.dimension_semantics<parallel>, #tpu.dimension_semantics<arbitrary>], iteration_bounds = array<i64: 1, 1>, scalar_prefetch = 0 : i64, scratch_operands = 3 : i64, tpu.core_type = #tpu.core_type<tc>, window_params = [{transform_indices = @transform_0, window_bounds = array<i64: 8, 128>}, {transform_indices = @transform_1, window_bounds = array<i64: 8, 8>}, {transform_indices = @transform_2, window_bounds = array<i64: 8, 8>}, {transform_indices = @transform_3, window_bounds = array<i64: 8, 1>}, {transform_indices = @transform_4, window_bounds = array<i64: 1, 8>}, {transform_indices = @transform_5, window_bounds = array<i64: 1, 1>}, {pipeline_mode = #tpu.pipeline_mode<synchronous>, transform_indices = @transform_6, window_bounds = array<i64: 1, 128>}, {transform_indices = @transform_7, window_bounds = array<i64: 8, 1>}, {transform_indices = @transform_8, window_bounds = array<i64: 8, 128>}, {transform_indices = @transform_9, window_bounds = array<i64: 1, 128>}, {transform_indices = @transform_10, window_bounds = array<i64: 1, 128>}]} {
    %c0_i32 = arith.constant 0 : i32
    %0 = arith.cmpi eq, %arg1, %c0_i32 : i32
    %1 = arith.extui %0 : i1 to i32
    %c0_i32_0 = arith.constant 0 : i32
    %2 = arith.cmpi ne, %1, %c0_i32_0 : i32
    scf.if %2 {
      %cst_30 = arith.constant 0xFF800000 : f32
      %49 = vector.broadcast %cst_30 : f32 to vector<8x1xf32>
      %c0_31 = arith.constant 0 : index
      %c0_32 = arith.constant 0 : index
      %50 = vector.load %arg13[%c0_31, %c0_32] : memref<8x1xf32, #tpu.memory_space<vmem>>, vector<8x1xf32>
      tpu.vector_store %arg13[%c0_31, %c0_32], %49 {strides = array<i32>} : memref<8x1xf32, #tpu.memory_space<vmem>>, vector<8x1xf32>,
      %cst_33 = arith.constant 0.000000e+00 : f32
      %51 = vector.broadcast %cst_33 : f32 to vector<8x1xf32>
      %c0_34 = arith.constant 0 : index
      %c0_35 = arith.constant 0 : index
      %52 = vector.load %arg14[%c0_34, %c0_35] : memref<8x1xf32, #tpu.memory_space<vmem>>, vector<8x1xf32>
      tpu.vector_store %arg14[%c0_34, %c0_35], %51 {strides = array<i32>} : memref<8x1xf32, #tpu.memory_space<vmem>>, vector<8x1xf32>,
      %cst_36 = arith.constant 0.000000e+00 : f32
      %53 = vector.broadcast %cst_36 : f32 to vector<8x128xf32>
      %c0_37 = arith.constant 0 : index
      %c0_38 = arith.constant 0 : index
      %54 = vector.load %arg15[%c0_37, %c0_38] : memref<8x128xf32, #tpu.memory_space<vmem>>, vector<8x128xf32>
      tpu.vector_store %arg15[%c0_37, %c0_38], %53 {strides = array<i32>} : memref<8x128xf32, #tpu.memory_space<vmem>>, vector<8x128xf32>,
    } else {
    }
    %c0 = arith.constant 0 : index
    %c0_1 = arith.constant 0 : index
    %3 = memref.load %arg7[%c0, %c0_1] : memref<1x1xf32, #tpu.memory_space<smem>>
    %c0_2 = arith.constant 0 : index
    %c0_3 = arith.constant 0 : index
    %4 = vector.load %arg5[%c0_2, %c0_3] : memref<8x1xf32, #tpu.memory_space<vmem>>, vector<8x1xf32>
    %c0_4 = arith.constant 0 : index
    %c0_5 = arith.constant 0 : index
    %5 = vector.load %arg6[%c0_4, %c0_5] : memref<1x8xf32, #tpu.memory_space<vmem>>, vector<1x8xf32>
    %6 = vector.broadcast %4 : vector<8x1xf32> to vector<8x8xf32>
    %7 = vector.broadcast %5 : vector<1x8xf32> to vector<8x8xf32>
    %8 = arith.addf %6, %7 : vector<8x8xf32>
    %c0_6 = arith.constant 0 : index
    %c0_7 = arith.constant 0 : index
    %9 = vector.load %arg4[%c0_6, %c0_7] : memref<8x8xbf16, #tpu.memory_space<vmem>>, vector<8x8xbf16>
    %10 = arith.extf %9 : vector<8x8xbf16> to vector<8x8xf32>
    %11 = vector.broadcast %3 : f32 to vector<8x8xf32>
    %12 = arith.mulf %11, %10 : vector<8x8xf32>
    %13 = arith.addf %8, %12 : vector<8x8xf32>
    %cst = arith.constant 2.000000e-01 : f32
    %14 = vector.broadcast %cst : f32 to vector<8x8xf32>
    %15 = arith.mulf %14, %13 : vector<8x8xf32>
    %16 = arith.maximumf %13, %15 : vector<8x8xf32>
    %c0_8 = arith.constant 0 : index
    %c0_9 = arith.constant 0 : index
    %17 = vector.load %arg3[%c0_8, %c0_9] : memref<8x8xi8, #tpu.memory_space<vmem>>, vector<8x8xi8>
    %c0_i8 = arith.constant 0 : i8
    %18 = vector.broadcast %c0_i8 : i8 to vector<8x8xi8>
    %19 = arith.cmpi ne, %17, %18 : vector<8x8xi8>
    %cst_10 = arith.constant -1.000000e+30 : f32
    %20 = vector.broadcast %cst_10 : f32 to vector<8x8xf32>
    %21 = arith.select %19, %16, %20 : vector<8x8xi1>, vector<8x8xf32>
    %c0_11 = arith.constant 0 : index
    %c0_12 = arith.constant 0 : index
    %22 = vector.load %arg13[%c0_11, %c0_12] : memref<8x1xf32, #tpu.memory_space<vmem>>, vector<8x1xf32>
    %cst_13 = arith.constant dense<0xFF800000> : vector<8xf32>
    %23 = vector.multi_reduction <maximumf>, %21, %cst_13 [1] : vector<8x8xf32> to vector<8xf32>
    %24 = vector.shape_cast %23 : vector<8xf32> to vector<8x1xf32>
    %25 = arith.maximumf %22, %24 : vector<8x1xf32>
    %26 = arith.subf %22, %25 : vector<8x1xf32>
    %27 = math.exp %26 : vector<8x1xf32>
    %28 = vector.broadcast %25 : vector<8x1xf32> to vector<8x8xf32>
    %29 = arith.subf %21, %28 : vector<8x8xf32>
    %30 = math.exp %29 : vector<8x8xf32>
    %c0_14 = arith.constant 0 : index
    %c0_15 = arith.constant 0 : index
    %31 = vector.load %arg14[%c0_14, %c0_15] : memref<8x1xf32, #tpu.memory_space<vmem>>, vector<8x1xf32>
    %32 = arith.mulf %27, %31 : vector<8x1xf32>
    %cst_16 = arith.constant dense<0.000000e+00> : vector<8xf32>
    %33 = vector.multi_reduction <add>, %30, %cst_16 [1] : vector<8x8xf32> to vector<8xf32>
    %34 = vector.shape_cast %33 : vector<8xf32> to vector<8x1xf32>
    %35 = arith.addf %32, %34 : vector<8x1xf32>
    %c0_17 = arith.constant 0 : index
    %c0_18 = arith.constant 0 : index
    %36 = vector.load %arg14[%c0_17, %c0_18] : memref<8x1xf32, #tpu.memory_space<vmem>>, vector<8x1xf32>
    tpu.vector_store %arg14[%c0_17, %c0_18], %35 {strides = array<i32>} : memref<8x1xf32, #tpu.memory_space<vmem>>, vector<8x1xf32>,
    %c0_19 = arith.constant 0 : index
    %c0_20 = arith.constant 0 : index
    %37 = vector.load %arg15[%c0_19, %c0_20] : memref<8x128xf32, #tpu.memory_space<vmem>>, vector<8x128xf32>
    %38 = vector.broadcast %27 : vector<8x1xf32> to vector<8x128xf32>
    %39 = arith.mulf %38, %37 : vector<8x128xf32>
    %40 = arith.truncf %30 : vector<8x8xf32> to vector<8x8xbf16>
    %c0_21 = arith.constant 0 : index
    %c0_22 = arith.constant 0 : index
    %41 = vector.load %arg2[%c0_21, %c0_22] : memref<8x128xbf16, #tpu.memory_space<vmem>>, vector<8x128xbf16>
    %cst_23 = arith.constant dense<0.000000e+00> : vector<8x128xf32>
    %42 = tpu.matmul %40, %41, %cst_23 {dimension_numbers = #tpu.dot_dimension_numbers<[1], [0], [0], [1], [0, 0, 1, 1], [], []>} : vector<8x8xbf16>, vector<8x128xbf16>, vector<8x128xf32> -> vector<8x128xf32>
    %43 = arith.addf %39, %42 : vector<8x128xf32>
    %c0_24 = arith.constant 0 : index
    %c0_25 = arith.constant 0 : index
    %44 = vector.load %arg15[%c0_24, %c0_25] : memref<8x128xf32, #tpu.memory_space<vmem>>, vector<8x128xf32>
    tpu.vector_store %arg15[%c0_24, %c0_25], %43 {strides = array<i32>} : memref<8x128xf32, #tpu.memory_space<vmem>>, vector<8x128xf32>,
    %c0_26 = arith.constant 0 : index
    %c0_27 = arith.constant 0 : index
    %45 = vector.load %arg13[%c0_26, %c0_27] : memref<8x1xf32, #tpu.memory_space<vmem>>, vector<8x1xf32>
    tpu.vector_store %arg13[%c0_26, %c0_27], %25 {strides = array<i32>} : memref<8x1xf32, #tpu.memory_space<vmem>>, vector<8x1xf32>,
    %c0_i32_28 = arith.constant 0 : i32
    %46 = arith.cmpi eq, %arg1, %c0_i32_28 : i32
    %47 = arith.extui %46 : i1 to i32
    %c0_i32_29 = arith.constant 0 : i32
    %48 = arith.cmpi ne, %47, %c0_i32_29 : i32
    scf.if %48 {
      %c0_30 = arith.constant 0 : index
      %c0_31 = arith.constant 0 : index
      %49 = vector.load %arg15[%c0_30, %c0_31] : memref<8x128xf32, #tpu.memory_space<vmem>>, vector<8x128xf32>
      %c0_32 = arith.constant 0 : index
      %c0_33 = arith.constant 0 : index
      %50 = vector.load %arg14[%c0_32, %c0_33] : memref<8x1xf32, #tpu.memory_space<vmem>>, vector<8x1xf32>
      %51 = tpu.reciprocal %50 {approx = true} : vector<8x1xf32> -> vector<8x1xf32>
      %52 = vector.broadcast %51 : vector<8x1xf32> to vector<8x128xf32>
      %53 = arith.mulf %49, %52 : vector<8x128xf32>
      %c0_34 = arith.constant 0 : index
      %c0_35 = arith.constant 0 : index
      %54 = vector.load %arg8[%c0_34, %c0_35] : memref<1x128xf32, #tpu.memory_space<vmem>>, vector<1x128xf32>
      %55 = vector.broadcast %54 : vector<1x128xf32> to vector<8x128xf32>
      %56 = arith.addf %53, %55 : vector<8x128xf32>
      %57 = arith.truncf %56 : vector<8x128xf32> to vector<8x128xbf16>
      %c0_36 = arith.constant 0 : index
      %c0_37 = arith.constant 0 : index
      %58 = vector.load %arg10[%c0_36, %c0_37] : memref<8x128xbf16, #tpu.memory_space<vmem>>, vector<8x128xbf16>
      tpu.vector_store %arg10[%c0_36, %c0_37], %57 {strides = array<i32>} : memref<8x128xbf16, #tpu.memory_space<vmem>>, vector<8x128xbf16>,
      %c0_38 = arith.constant 0 : index
      %c0_39 = arith.constant 0 : index
      %59 = vector.load %arg9[%c0_38, %c0_39] : memref<8x1xf32, #tpu.memory_space<vmem>>, vector<8x1xf32>
      %60 = vector.broadcast %59 : vector<8x1xf32> to vector<8x128xf32>
      %61 = arith.mulf %56, %60 : vector<8x128xf32>
      %cst_40 = arith.constant dense<0.000000e+00> : vector<128xf32>
      %62 = vector.multi_reduction <add>, %61, %cst_40 [0] : vector<8x128xf32> to vector<128xf32>
      %63 = vector.shape_cast %62 : vector<128xf32> to vector<1x128xf32>
      %c0_41 = arith.constant 0 : index
      %c0_42 = arith.constant 0 : index
      %64 = vector.load %arg11[%c0_41, %c0_42] : memref<1x128xf32, #tpu.memory_space<vmem>>, vector<1x128xf32>
      tpu.vector_store %arg11[%c0_41, %c0_42], %63 {strides = array<i32>} : memref<1x128xf32, #tpu.memory_space<vmem>>, vector<1x128xf32>,
      %65 = arith.mulf %61, %61 : vector<8x128xf32>
      %cst_43 = arith.constant dense<0.000000e+00> : vector<128xf32>
      %66 = vector.multi_reduction <add>, %65, %cst_43 [0] : vector<8x128xf32> to vector<128xf32>
      %67 = vector.shape_cast %66 : vector<128xf32> to vector<1x128xf32>
      %c0_44 = arith.constant 0 : index
      %c0_45 = arith.constant 0 : index
      %68 = vector.load %arg12[%c0_44, %c0_45] : memref<1x128xf32, #tpu.memory_space<vmem>>, vector<1x128xf32>
      tpu.vector_store %arg12[%c0_44, %c0_45], %67 {strides = array<i32>} : memref<1x128xf32, #tpu.memory_space<vmem>>, vector<1x128xf32>,
    } else {
    }
    return
  }
  func.func @transform_0(%arg0: i32, %arg1: i32) -> (i32, i32) {
    %c0_i32 = arith.constant 0 : i32
    %c0_i32_0 = arith.constant 0 : i32
    return %arg1, %c0_i32 : i32, i32
  }
  func.func @transform_1(%arg0: i32, %arg1: i32) -> (i32, i32) {
    %c0_i32 = arith.constant 0 : i32
    return %arg0, %arg1 : i32, i32
  }
  func.func @transform_2(%arg0: i32, %arg1: i32) -> (i32, i32) {
    %c0_i32 = arith.constant 0 : i32
    return %arg0, %arg1 : i32, i32
  }
  func.func @transform_3(%arg0: i32, %arg1: i32) -> (i32, i32) {
    %c0_i32 = arith.constant 0 : i32
    %c0_i32_0 = arith.constant 0 : i32
    return %arg0, %c0_i32 : i32, i32
  }
  func.func @transform_4(%arg0: i32, %arg1: i32) -> (i32, i32) {
    %c0_i32 = arith.constant 0 : i32
    %c0_i32_0 = arith.constant 0 : i32
    return %c0_i32, %arg1 : i32, i32
  }
  func.func @transform_5(%arg0: i32, %arg1: i32) -> (i32, i32) {
    %c0_i32 = arith.constant 0 : i32
    %c0_i32_0 = arith.constant 0 : i32
    %c0_i32_1 = arith.constant 0 : i32
    return %c0_i32, %c0_i32_0 : i32, i32
  }
  func.func @transform_6(%arg0: i32, %arg1: i32) -> (i32, i32) {
    %c0_i32 = arith.constant 0 : i32
    %c0_i32_0 = arith.constant 0 : i32
    %c0_i32_1 = arith.constant 0 : i32
    return %c0_i32, %c0_i32_0 : i32, i32
  }
  func.func @transform_7(%arg0: i32, %arg1: i32) -> (i32, i32) {
    %c0_i32 = arith.constant 0 : i32
    %c0_i32_0 = arith.constant 0 : i32
    return %arg0, %c0_i32 : i32, i32
  }
  func.func @transform_8(%arg0: i32, %arg1: i32) -> (i32, i32) {
    %c0_i32 = arith.constant 0 : i32
    %c0_i32_0 = arith.constant 0 : i32
    return %arg0, %c0_i32 : i32, i32
  }
  func.func @transform_9(%arg0: i32, %arg1: i32) -> (i32, i32) {
    %c0_i32 = arith.constant 0 : i32
    %c0_i32_0 = arith.constant 0 : i32
    return %arg0, %c0_i32 : i32, i32
  }
  func.func @transform_10(%arg0: i32, %arg1: i32) -> (i32, i32) {
    %c0_i32 = arith.constant 0 : i32
    %c0_i32_0 = arith.constant 0 : i32
    return %arg0, %c0_i32 : i32, i32
  }
}

module attributes {stable_mosaic.version = 11 : i64} {
  func.func @_transform_kernel(%arg0: i32, %arg1: memref<8x128xbf16, #tpu.memory_space<vmem>>, %arg2: memref<128x128xbf16, #tpu.memory_space<vmem>>, %arg3: memref<1x128xf32, #tpu.memory_space<vmem>>, %arg4: memref<1x128xf32, #tpu.memory_space<vmem>>, %arg5: memref<1x128xf32, #tpu.memory_space<vmem>>, %arg6: memref<1x128xf32, #tpu.memory_space<vmem>>, %arg7: memref<8x128xbf16, #tpu.memory_space<vmem>>, %arg8: memref<8x1xf32, #tpu.memory_space<vmem>>, %arg9: memref<8x1xf32, #tpu.memory_space<vmem>>) attributes {dimension_semantics = [#tpu.dimension_semantics<parallel>], iteration_bounds = array<i64: 1>, scalar_prefetch = 0 : i64, scratch_operands = 0 : i64, tpu.core_type = #tpu.core_type<tc>, window_params = [{transform_indices = @transform_0, window_bounds = array<i64: 8, 128>}, {pipeline_mode = #tpu.pipeline_mode<synchronous>, transform_indices = @transform_1, window_bounds = array<i64: 128, 128>}, {pipeline_mode = #tpu.pipeline_mode<synchronous>, transform_indices = @transform_2, window_bounds = array<i64: 1, 128>}, {pipeline_mode = #tpu.pipeline_mode<synchronous>, transform_indices = @transform_3, window_bounds = array<i64: 1, 128>}, {pipeline_mode = #tpu.pipeline_mode<synchronous>, transform_indices = @transform_4, window_bounds = array<i64: 1, 128>}, {pipeline_mode = #tpu.pipeline_mode<synchronous>, transform_indices = @transform_5, window_bounds = array<i64: 1, 128>}, {transform_indices = @transform_6, window_bounds = array<i64: 8, 128>}, {transform_indices = @transform_7, window_bounds = array<i64: 8, 1>}, {transform_indices = @transform_8, window_bounds = array<i64: 8, 1>}]} {
    %c0 = arith.constant 0 : index
    %c0_0 = arith.constant 0 : index
    %0 = vector.load %arg1[%c0, %c0_0] : memref<8x128xbf16, #tpu.memory_space<vmem>>, vector<8x128xbf16>
    %1 = arith.extf %0 : vector<8x128xbf16> to vector<8x128xf32>
    %c0_1 = arith.constant 0 : index
    %c0_2 = arith.constant 0 : index
    %2 = vector.load %arg5[%c0_1, %c0_2] : memref<1x128xf32, #tpu.memory_space<vmem>>, vector<1x128xf32>
    %3 = vector.broadcast %2 : vector<1x128xf32> to vector<8x128xf32>
    %4 = arith.mulf %1, %3 : vector<8x128xf32>
    %c0_3 = arith.constant 0 : index
    %c0_4 = arith.constant 0 : index
    %5 = vector.load %arg6[%c0_3, %c0_4] : memref<1x128xf32, #tpu.memory_space<vmem>>, vector<1x128xf32>
    %6 = vector.broadcast %5 : vector<1x128xf32> to vector<8x128xf32>
    %7 = arith.addf %4, %6 : vector<8x128xf32>
    %cst = arith.constant 0.000000e+00 : f32
    %8 = vector.broadcast %cst : f32 to vector<8x128xf32>
    %9 = arith.maximumf %7, %8 : vector<8x128xf32>
    %10 = arith.truncf %9 : vector<8x128xf32> to vector<8x128xbf16>
    %c0_5 = arith.constant 0 : index
    %c0_6 = arith.constant 0 : index
    %11 = vector.load %arg2[%c0_5, %c0_6] : memref<128x128xbf16, #tpu.memory_space<vmem>>, vector<128x128xbf16>
    %cst_7 = arith.constant dense<0.000000e+00> : vector<8x128xf32>
    %12 = tpu.matmul %10, %11, %cst_7 {dimension_numbers = #tpu.dot_dimension_numbers<[1], [0], [0], [1], [0, 0, 1, 1], [], []>} : vector<8x128xbf16>, vector<128x128xbf16>, vector<8x128xf32> -> vector<8x128xf32>
    %c0_8 = arith.constant 0 : index
    %c0_9 = arith.constant 0 : index
    %13 = vector.load %arg4[%c0_8, %c0_9] : memref<1x128xf32, #tpu.memory_space<vmem>>, vector<1x128xf32>
    %14 = vector.broadcast %13 : vector<1x128xf32> to vector<8x128xf32>
    %15 = arith.mulf %12, %14 : vector<8x128xf32>
    %cst_10 = arith.constant dense<0.000000e+00> : vector<8xf32>
    %16 = vector.multi_reduction <add>, %15, %cst_10 [1] : vector<8x128xf32> to vector<8xf32>
    %17 = vector.shape_cast %16 : vector<8xf32> to vector<8x1xf32>
    %c0_11 = arith.constant 0 : index
    %c0_12 = arith.constant 0 : index
    %18 = vector.load %arg8[%c0_11, %c0_12] : memref<8x1xf32, #tpu.memory_space<vmem>>, vector<8x1xf32>
    tpu.vector_store %arg8[%c0_11, %c0_12], %17 {strides = array<i32>} : memref<8x1xf32, #tpu.memory_space<vmem>>, vector<8x1xf32>,
    %c0_13 = arith.constant 0 : index
    %c0_14 = arith.constant 0 : index
    %19 = vector.load %arg3[%c0_13, %c0_14] : memref<1x128xf32, #tpu.memory_space<vmem>>, vector<1x128xf32>
    %20 = vector.broadcast %19 : vector<1x128xf32> to vector<8x128xf32>
    %21 = arith.mulf %12, %20 : vector<8x128xf32>
    %cst_15 = arith.constant dense<0.000000e+00> : vector<8xf32>
    %22 = vector.multi_reduction <add>, %21, %cst_15 [1] : vector<8x128xf32> to vector<8xf32>
    %23 = vector.shape_cast %22 : vector<8xf32> to vector<8x1xf32>
    %c0_16 = arith.constant 0 : index
    %c0_17 = arith.constant 0 : index
    %24 = vector.load %arg9[%c0_16, %c0_17] : memref<8x1xf32, #tpu.memory_space<vmem>>, vector<8x1xf32>
    tpu.vector_store %arg9[%c0_16, %c0_17], %23 {strides = array<i32>} : memref<8x1xf32, #tpu.memory_space<vmem>>, vector<8x1xf32>,
    %25 = arith.truncf %12 : vector<8x128xf32> to vector<8x128xbf16>
    %c0_18 = arith.constant 0 : index
    %c0_19 = arith.constant 0 : index
    %26 = vector.load %arg7[%c0_18, %c0_19] : memref<8x128xbf16, #tpu.memory_space<vmem>>, vector<8x128xbf16>
    tpu.vector_store %arg7[%c0_18, %c0_19], %25 {strides = array<i32>} : memref<8x128xbf16, #tpu.memory_space<vmem>>, vector<8x128xbf16>,
    return
  }
  func.func @transform_0(%arg0: i32) -> (i32, i32) {
    %c0_i32 = arith.constant 0 : i32
    %c0_i32_0 = arith.constant 0 : i32
    return %arg0, %c0_i32 : i32, i32
  }
  func.func @transform_1(%arg0: i32) -> (i32, i32) {
    %c0_i32 = arith.constant 0 : i32
    %c0_i32_0 = arith.constant 0 : i32
    %c0_i32_1 = arith.constant 0 : i32
    return %c0_i32, %c0_i32_0 : i32, i32
  }
  func.func @transform_2(%arg0: i32) -> (i32, i32) {
    %c0_i32 = arith.constant 0 : i32
    %c0_i32_0 = arith.constant 0 : i32
    %c0_i32_1 = arith.constant 0 : i32
    return %c0_i32, %c0_i32_0 : i32, i32
  }
  func.func @transform_3(%arg0: i32) -> (i32, i32) {
    %c0_i32 = arith.constant 0 : i32
    %c0_i32_0 = arith.constant 0 : i32
    %c0_i32_1 = arith.constant 0 : i32
    return %c0_i32, %c0_i32_0 : i32, i32
  }
  func.func @transform_4(%arg0: i32) -> (i32, i32) {
    %c0_i32 = arith.constant 0 : i32
    %c0_i32_0 = arith.constant 0 : i32
    %c0_i32_1 = arith.constant 0 : i32
    return %c0_i32, %c0_i32_0 : i32, i32
  }
  func.func @transform_5(%arg0: i32) -> (i32, i32) {
    %c0_i32 = arith.constant 0 : i32
    %c0_i32_0 = arith.constant 0 : i32
    %c0_i32_1 = arith.constant 0 : i32
    return %c0_i32, %c0_i32_0 : i32, i32
  }
  func.func @transform_6(%arg0: i32) -> (i32, i32) {
    %c0_i32 = arith.constant 0 : i32
    %c0_i32_0 = arith.constant 0 : i32
    return %arg0, %c0_i32 : i32, i32
  }
  func.func @transform_7(%arg0: i32) -> (i32, i32) {
    %c0_i32 = arith.constant 0 : i32
    %c0_i32_0 = arith.constant 0 : i32
    return %arg0, %c0_i32 : i32, i32
  }
  func.func @transform_8(%arg0: i32) -> (i32, i32) {
    %c0_i32 = arith.constant 0 : i32
    %c0_i32_0 = arith.constant 0 : i32
    return %arg0, %c0_i32 : i32, i32
  }
}

module attributes {stable_mosaic.version = 11 : i64} {
  func.func @_residual_kernel(%arg0: i32, %arg1: memref<8x128xbf16, #tpu.memory_space<vmem>>, %arg2: memref<1x128xf32, #tpu.memory_space<vmem>>, %arg3: memref<1x128xf32, #tpu.memory_space<vmem>>, %arg4: memref<8x128xf32, #tpu.memory_space<vmem>>, %arg5: memref<128x128xbf16, #tpu.memory_space<vmem>>, %arg6: memref<1x128xf32, #tpu.memory_space<vmem>>, %arg7: memref<8x128xbf16, #tpu.memory_space<vmem>>) attributes {dimension_semantics = [#tpu.dimension_semantics<parallel>], iteration_bounds = array<i64: 1>, scalar_prefetch = 0 : i64, scratch_operands = 0 : i64, tpu.core_type = #tpu.core_type<tc>, window_params = [{transform_indices = @transform_0, window_bounds = array<i64: 8, 128>}, {pipeline_mode = #tpu.pipeline_mode<synchronous>, transform_indices = @transform_1, window_bounds = array<i64: 1, 128>}, {pipeline_mode = #tpu.pipeline_mode<synchronous>, transform_indices = @transform_2, window_bounds = array<i64: 1, 128>}, {transform_indices = @transform_3, window_bounds = array<i64: 8, 128>}, {pipeline_mode = #tpu.pipeline_mode<synchronous>, transform_indices = @transform_4, window_bounds = array<i64: 128, 128>}, {pipeline_mode = #tpu.pipeline_mode<synchronous>, transform_indices = @transform_5, window_bounds = array<i64: 1, 128>}, {transform_indices = @transform_6, window_bounds = array<i64: 8, 128>}]} {
    %c0 = arith.constant 0 : index
    %c0_0 = arith.constant 0 : index
    %0 = vector.load %arg1[%c0, %c0_0] : memref<8x128xbf16, #tpu.memory_space<vmem>>, vector<8x128xbf16>
    %1 = arith.extf %0 : vector<8x128xbf16> to vector<8x128xf32>
    %c0_1 = arith.constant 0 : index
    %c0_2 = arith.constant 0 : index
    %2 = vector.load %arg2[%c0_1, %c0_2] : memref<1x128xf32, #tpu.memory_space<vmem>>, vector<1x128xf32>
    %3 = vector.broadcast %2 : vector<1x128xf32> to vector<8x128xf32>
    %4 = arith.mulf %1, %3 : vector<8x128xf32>
    %c0_3 = arith.constant 0 : index
    %c0_4 = arith.constant 0 : index
    %5 = vector.load %arg3[%c0_3, %c0_4] : memref<1x128xf32, #tpu.memory_space<vmem>>, vector<1x128xf32>
    %6 = vector.broadcast %5 : vector<1x128xf32> to vector<8x128xf32>
    %7 = arith.addf %4, %6 : vector<8x128xf32>
    %c0_5 = arith.constant 0 : index
    %c0_6 = arith.constant 0 : index
    %8 = vector.load %arg4[%c0_5, %c0_6] : memref<8x128xf32, #tpu.memory_space<vmem>>, vector<8x128xf32>
    %9 = arith.truncf %8 : vector<8x128xf32> to vector<8x128xbf16>
    %c0_7 = arith.constant 0 : index
    %c0_8 = arith.constant 0 : index
    %10 = vector.load %arg5[%c0_7, %c0_8] : memref<128x128xbf16, #tpu.memory_space<vmem>>, vector<128x128xbf16>
    %cst = arith.constant dense<0.000000e+00> : vector<8x128xf32>
    %11 = tpu.matmul %9, %10, %cst {dimension_numbers = #tpu.dot_dimension_numbers<[1], [0], [0], [1], [0, 0, 1, 1], [], []>} : vector<8x128xbf16>, vector<128x128xbf16>, vector<8x128xf32> -> vector<8x128xf32>
    %c0_9 = arith.constant 0 : index
    %c0_10 = arith.constant 0 : index
    %12 = vector.load %arg6[%c0_9, %c0_10] : memref<1x128xf32, #tpu.memory_space<vmem>>, vector<1x128xf32>
    %13 = vector.broadcast %12 : vector<1x128xf32> to vector<8x128xf32>
    %14 = arith.addf %11, %13 : vector<8x128xf32>
    %15 = arith.addf %7, %14 : vector<8x128xf32>
    %cst_11 = arith.constant 0.000000e+00 : f32
    %16 = vector.broadcast %cst_11 : f32 to vector<8x128xf32>
    %17 = arith.maximumf %15, %16 : vector<8x128xf32>
    %18 = arith.truncf %17 : vector<8x128xf32> to vector<8x128xbf16>
    %c0_12 = arith.constant 0 : index
    %c0_13 = arith.constant 0 : index
    %19 = vector.load %arg7[%c0_12, %c0_13] : memref<8x128xbf16, #tpu.memory_space<vmem>>, vector<8x128xbf16>
    tpu.vector_store %arg7[%c0_12, %c0_13], %18 {strides = array<i32>} : memref<8x128xbf16, #tpu.memory_space<vmem>>, vector<8x128xbf16>,
    return
  }
  func.func @transform_0(%arg0: i32) -> (i32, i32) {
    %c0_i32 = arith.constant 0 : i32
    %c0_i32_0 = arith.constant 0 : i32
    return %arg0, %c0_i32 : i32, i32
  }
  func.func @transform_1(%arg0: i32) -> (i32, i32) {
    %c0_i32 = arith.constant 0 : i32
    %c0_i32_0 = arith.constant 0 : i32
    %c0_i32_1 = arith.constant 0 : i32
    return %c0_i32, %c0_i32_0 : i32, i32
  }
  func.func @transform_2(%arg0: i32) -> (i32, i32) {
    %c0_i32 = arith.constant 0 : i32
    %c0_i32_0 = arith.constant 0 : i32
    %c0_i32_1 = arith.constant 0 : i32
    return %c0_i32, %c0_i32_0 : i32, i32
  }
  func.func @transform_3(%arg0: i32) -> (i32, i32) {
    %c0_i32 = arith.constant 0 : i32
    %c0_i32_0 = arith.constant 0 : i32
    return %arg0, %c0_i32 : i32, i32
  }
  func.func @transform_4(%arg0: i32) -> (i32, i32) {
    %c0_i32 = arith.constant 0 : i32
    %c0_i32_0 = arith.constant 0 : i32
    %c0_i32_1 = arith.constant 0 : i32
    return %c0_i32, %c0_i32_0 : i32, i32
  }
  func.func @transform_5(%arg0: i32) -> (i32, i32) {
    %c0_i32 = arith.constant 0 : i32
    %c0_i32_0 = arith.constant 0 : i32
    %c0_i32_1 = arith.constant 0 : i32
    return %c0_i32, %c0_i32_0 : i32, i32
  }
  func.func @transform_6(%arg0: i32) -> (i32, i32) {
    %c0_i32 = arith.constant 0 : i32
    %c0_i32_0 = arith.constant 0 : i32
    return %arg0, %c0_i32 : i32, i32
  }
}

module attributes {stable_mosaic.version = 11 : i64} {
  func.func @_transform_kernel(%arg0: i32, %arg1: memref<8x128xbf16, #tpu.memory_space<vmem>>, %arg2: memref<128x128xbf16, #tpu.memory_space<vmem>>, %arg3: memref<1x128xf32, #tpu.memory_space<vmem>>, %arg4: memref<1x128xf32, #tpu.memory_space<vmem>>, %arg5: memref<1x128xf32, #tpu.memory_space<vmem>>, %arg6: memref<1x128xf32, #tpu.memory_space<vmem>>, %arg7: memref<8x128xbf16, #tpu.memory_space<vmem>>, %arg8: memref<8x1xf32, #tpu.memory_space<vmem>>, %arg9: memref<8x1xf32, #tpu.memory_space<vmem>>) attributes {dimension_semantics = [#tpu.dimension_semantics<parallel>], iteration_bounds = array<i64: 1>, scalar_prefetch = 0 : i64, scratch_operands = 0 : i64, tpu.core_type = #tpu.core_type<tc>, window_params = [{transform_indices = @transform_0, window_bounds = array<i64: 8, 128>}, {pipeline_mode = #tpu.pipeline_mode<synchronous>, transform_indices = @transform_1, window_bounds = array<i64: 128, 128>}, {pipeline_mode = #tpu.pipeline_mode<synchronous>, transform_indices = @transform_2, window_bounds = array<i64: 1, 128>}, {pipeline_mode = #tpu.pipeline_mode<synchronous>, transform_indices = @transform_3, window_bounds = array<i64: 1, 128>}, {pipeline_mode = #tpu.pipeline_mode<synchronous>, transform_indices = @transform_4, window_bounds = array<i64: 1, 128>}, {pipeline_mode = #tpu.pipeline_mode<synchronous>, transform_indices = @transform_5, window_bounds = array<i64: 1, 128>}, {transform_indices = @transform_6, window_bounds = array<i64: 8, 128>}, {transform_indices = @transform_7, window_bounds = array<i64: 8, 1>}, {transform_indices = @transform_8, window_bounds = array<i64: 8, 1>}]} {
    %c0 = arith.constant 0 : index
    %c0_0 = arith.constant 0 : index
    %0 = vector.load %arg1[%c0, %c0_0] : memref<8x128xbf16, #tpu.memory_space<vmem>>, vector<8x128xbf16>
    %1 = arith.extf %0 : vector<8x128xbf16> to vector<8x128xf32>
    %2 = arith.truncf %1 : vector<8x128xf32> to vector<8x128xbf16>
    %c0_1 = arith.constant 0 : index
    %c0_2 = arith.constant 0 : index
    %3 = vector.load %arg2[%c0_1, %c0_2] : memref<128x128xbf16, #tpu.memory_space<vmem>>, vector<128x128xbf16>
    %cst = arith.constant dense<0.000000e+00> : vector<8x128xf32>
    %4 = tpu.matmul %2, %3, %cst {dimension_numbers = #tpu.dot_dimension_numbers<[1], [0], [0], [1], [0, 0, 1, 1], [], []>} : vector<8x128xbf16>, vector<128x128xbf16>, vector<8x128xf32> -> vector<8x128xf32>
    %c0_3 = arith.constant 0 : index
    %c0_4 = arith.constant 0 : index
    %5 = vector.load %arg4[%c0_3, %c0_4] : memref<1x128xf32, #tpu.memory_space<vmem>>, vector<1x128xf32>
    %6 = vector.broadcast %5 : vector<1x128xf32> to vector<8x128xf32>
    %7 = arith.mulf %4, %6 : vector<8x128xf32>
    %cst_5 = arith.constant dense<0.000000e+00> : vector<8xf32>
    %8 = vector.multi_reduction <add>, %7, %cst_5 [1] : vector<8x128xf32> to vector<8xf32>
    %9 = vector.shape_cast %8 : vector<8xf32> to vector<8x1xf32>
    %c0_6 = arith.constant 0 : index
    %c0_7 = arith.constant 0 : index
    %10 = vector.load %arg8[%c0_6, %c0_7] : memref<8x1xf32, #tpu.memory_space<vmem>>, vector<8x1xf32>
    tpu.vector_store %arg8[%c0_6, %c0_7], %9 {strides = array<i32>} : memref<8x1xf32, #tpu.memory_space<vmem>>, vector<8x1xf32>,
    %c0_8 = arith.constant 0 : index
    %c0_9 = arith.constant 0 : index
    %11 = vector.load %arg3[%c0_8, %c0_9] : memref<1x128xf32, #tpu.memory_space<vmem>>, vector<1x128xf32>
    %12 = vector.broadcast %11 : vector<1x128xf32> to vector<8x128xf32>
    %13 = arith.mulf %4, %12 : vector<8x128xf32>
    %cst_10 = arith.constant dense<0.000000e+00> : vector<8xf32>
    %14 = vector.multi_reduction <add>, %13, %cst_10 [1] : vector<8x128xf32> to vector<8xf32>
    %15 = vector.shape_cast %14 : vector<8xf32> to vector<8x1xf32>
    %c0_11 = arith.constant 0 : index
    %c0_12 = arith.constant 0 : index
    %16 = vector.load %arg9[%c0_11, %c0_12] : memref<8x1xf32, #tpu.memory_space<vmem>>, vector<8x1xf32>
    tpu.vector_store %arg9[%c0_11, %c0_12], %15 {strides = array<i32>} : memref<8x1xf32, #tpu.memory_space<vmem>>, vector<8x1xf32>,
    %17 = arith.truncf %4 : vector<8x128xf32> to vector<8x128xbf16>
    %c0_13 = arith.constant 0 : index
    %c0_14 = arith.constant 0 : index
    %18 = vector.load %arg7[%c0_13, %c0_14] : memref<8x128xbf16, #tpu.memory_space<vmem>>, vector<8x128xbf16>
    tpu.vector_store %arg7[%c0_13, %c0_14], %17 {strides = array<i32>} : memref<8x128xbf16, #tpu.memory_space<vmem>>, vector<8x128xbf16>,
    return
  }
  func.func @transform_0(%arg0: i32) -> (i32, i32) {
    %c0_i32 = arith.constant 0 : i32
    %c0_i32_0 = arith.constant 0 : i32
    return %arg0, %c0_i32 : i32, i32
  }
  func.func @transform_1(%arg0: i32) -> (i32, i32) {
    %c0_i32 = arith.constant 0 : i32
    %c0_i32_0 = arith.constant 0 : i32
    %c0_i32_1 = arith.constant 0 : i32
    return %c0_i32, %c0_i32_0 : i32, i32
  }
  func.func @transform_2(%arg0: i32) -> (i32, i32) {
    %c0_i32 = arith.constant 0 : i32
    %c0_i32_0 = arith.constant 0 : i32
    %c0_i32_1 = arith.constant 0 : i32
    return %c0_i32, %c0_i32_0 : i32, i32
  }
  func.func @transform_3(%arg0: i32) -> (i32, i32) {
    %c0_i32 = arith.constant 0 : i32
    %c0_i32_0 = arith.constant 0 : i32
    %c0_i32_1 = arith.constant 0 : i32
    return %c0_i32, %c0_i32_0 : i32, i32
  }
  func.func @transform_4(%arg0: i32) -> (i32, i32) {
    %c0_i32 = arith.constant 0 : i32
    %c0_i32_0 = arith.constant 0 : i32
    %c0_i32_1 = arith.constant 0 : i32
    return %c0_i32, %c0_i32_0 : i32, i32
  }
  func.func @transform_5(%arg0: i32) -> (i32, i32) {
    %c0_i32 = arith.constant 0 : i32
    %c0_i32_0 = arith.constant 0 : i32
    %c0_i32_1 = arith.constant 0 : i32
    return %c0_i32, %c0_i32_0 : i32, i32
  }
  func.func @transform_6(%arg0: i32) -> (i32, i32) {
    %c0_i32 = arith.constant 0 : i32
    %c0_i32_0 = arith.constant 0 : i32
    return %arg0, %c0_i32 : i32, i32
  }
  func.func @transform_7(%arg0: i32) -> (i32, i32) {
    %c0_i32 = arith.constant 0 : i32
    %c0_i32_0 = arith.constant 0 : i32
    return %arg0, %c0_i32 : i32, i32
  }
  func.func @transform_8(%arg0: i32) -> (i32, i32) {
    %c0_i32 = arith.constant 0 : i32
    %c0_i32_0 = arith.constant 0 : i32
    return %arg0, %c0_i32 : i32, i32
  }
}

module attributes {stable_mosaic.version = 11 : i64} {
  func.func @_residual_kernel(%arg0: i32, %arg1: memref<8x128xbf16, #tpu.memory_space<vmem>>, %arg2: memref<1x128xf32, #tpu.memory_space<vmem>>, %arg3: memref<1x128xf32, #tpu.memory_space<vmem>>, %arg4: memref<8x128xbf16, #tpu.memory_space<vmem>>, %arg5: memref<8x128xbf16, #tpu.memory_space<vmem>>) attributes {dimension_semantics = [#tpu.dimension_semantics<parallel>], iteration_bounds = array<i64: 1>, scalar_prefetch = 0 : i64, scratch_operands = 0 : i64, tpu.core_type = #tpu.core_type<tc>, window_params = [{transform_indices = @transform_0, window_bounds = array<i64: 8, 128>}, {pipeline_mode = #tpu.pipeline_mode<synchronous>, transform_indices = @transform_1, window_bounds = array<i64: 1, 128>}, {pipeline_mode = #tpu.pipeline_mode<synchronous>, transform_indices = @transform_2, window_bounds = array<i64: 1, 128>}, {transform_indices = @transform_3, window_bounds = array<i64: 8, 128>}, {transform_indices = @transform_4, window_bounds = array<i64: 8, 128>}]} {
    %c0 = arith.constant 0 : index
    %c0_0 = arith.constant 0 : index
    %0 = vector.load %arg1[%c0, %c0_0] : memref<8x128xbf16, #tpu.memory_space<vmem>>, vector<8x128xbf16>
    %1 = arith.extf %0 : vector<8x128xbf16> to vector<8x128xf32>
    %c0_1 = arith.constant 0 : index
    %c0_2 = arith.constant 0 : index
    %2 = vector.load %arg2[%c0_1, %c0_2] : memref<1x128xf32, #tpu.memory_space<vmem>>, vector<1x128xf32>
    %3 = vector.broadcast %2 : vector<1x128xf32> to vector<8x128xf32>
    %4 = arith.mulf %1, %3 : vector<8x128xf32>
    %c0_3 = arith.constant 0 : index
    %c0_4 = arith.constant 0 : index
    %5 = vector.load %arg3[%c0_3, %c0_4] : memref<1x128xf32, #tpu.memory_space<vmem>>, vector<1x128xf32>
    %6 = vector.broadcast %5 : vector<1x128xf32> to vector<8x128xf32>
    %7 = arith.addf %4, %6 : vector<8x128xf32>
    %c0_5 = arith.constant 0 : index
    %c0_6 = arith.constant 0 : index
    %8 = vector.load %arg4[%c0_5, %c0_6] : memref<8x128xbf16, #tpu.memory_space<vmem>>, vector<8x128xbf16>
    %9 = arith.extf %8 : vector<8x128xbf16> to vector<8x128xf32>
    %10 = arith.addf %7, %9 : vector<8x128xf32>
    %cst = arith.constant 0.000000e+00 : f32
    %11 = vector.broadcast %cst : f32 to vector<8x128xf32>
    %12 = arith.maximumf %10, %11 : vector<8x128xf32>
    %13 = arith.truncf %12 : vector<8x128xf32> to vector<8x128xbf16>
    %c0_7 = arith.constant 0 : index
    %c0_8 = arith.constant 0 : index
    %14 = vector.load %arg5[%c0_7, %c0_8] : memref<8x128xbf16, #tpu.memory_space<vmem>>, vector<8x128xbf16>
    tpu.vector_store %arg5[%c0_7, %c0_8], %13 {strides = array<i32>} : memref<8x128xbf16, #tpu.memory_space<vmem>>, vector<8x128xbf16>,
    return
  }
  func.func @transform_0(%arg0: i32) -> (i32, i32) {
    %c0_i32 = arith.constant 0 : i32
    %c0_i32_0 = arith.constant 0 : i32
    return %arg0, %c0_i32 : i32, i32
  }
  func.func @transform_1(%arg0: i32) -> (i32, i32) {
    %c0_i32 = arith.constant 0 : i32
    %c0_i32_0 = arith.constant 0 : i32
    %c0_i32_1 = arith.constant 0 : i32
    return %c0_i32, %c0_i32_0 : i32, i32
  }
  func.func @transform_2(%arg0: i32) -> (i32, i32) {
    %c0_i32 = arith.constant 0 : i32
    %c0_i32_0 = arith.constant 0 : i32
    %c0_i32_1 = arith.constant 0 : i32
    return %c0_i32, %c0_i32_0 : i32, i32
  }
  func.func @transform_3(%arg0: i32) -> (i32, i32) {
    %c0_i32 = arith.constant 0 : i32
    %c0_i32_0 = arith.constant 0 : i32
    return %arg0, %c0_i32 : i32, i32
  }
  func.func @transform_4(%arg0: i32) -> (i32, i32) {
    %c0_i32 = arith.constant 0 : i32
    %c0_i32_0 = arith.constant 0 : i32
    return %arg0, %c0_i32 : i32, i32
  }
}

module attributes {stable_mosaic.version = 11 : i64} {
  func.func @_residual_kernel(%arg0: i32, %arg1: memref<8x128xbf16, #tpu.memory_space<vmem>>, %arg2: memref<1x128xf32, #tpu.memory_space<vmem>>, %arg3: memref<1x128xf32, #tpu.memory_space<vmem>>, %arg4: memref<8x128xbf16, #tpu.memory_space<vmem>>, %arg5: memref<128x128xbf16, #tpu.memory_space<vmem>>, %arg6: memref<1x128xf32, #tpu.memory_space<vmem>>, %arg7: memref<8x128xbf16, #tpu.memory_space<vmem>>) attributes {dimension_semantics = [#tpu.dimension_semantics<parallel>], iteration_bounds = array<i64: 1>, scalar_prefetch = 0 : i64, scratch_operands = 0 : i64, tpu.core_type = #tpu.core_type<tc>, window_params = [{transform_indices = @transform_0, window_bounds = array<i64: 8, 128>}, {pipeline_mode = #tpu.pipeline_mode<synchronous>, transform_indices = @transform_1, window_bounds = array<i64: 1, 128>}, {pipeline_mode = #tpu.pipeline_mode<synchronous>, transform_indices = @transform_2, window_bounds = array<i64: 1, 128>}, {transform_indices = @transform_3, window_bounds = array<i64: 8, 128>}, {pipeline_mode = #tpu.pipeline_mode<synchronous>, transform_indices = @transform_4, window_bounds = array<i64: 128, 128>}, {pipeline_mode = #tpu.pipeline_mode<synchronous>, transform_indices = @transform_5, window_bounds = array<i64: 1, 128>}, {transform_indices = @transform_6, window_bounds = array<i64: 8, 128>}]} {
    %c0 = arith.constant 0 : index
    %c0_0 = arith.constant 0 : index
    %0 = vector.load %arg1[%c0, %c0_0] : memref<8x128xbf16, #tpu.memory_space<vmem>>, vector<8x128xbf16>
    %1 = arith.extf %0 : vector<8x128xbf16> to vector<8x128xf32>
    %c0_1 = arith.constant 0 : index
    %c0_2 = arith.constant 0 : index
    %2 = vector.load %arg2[%c0_1, %c0_2] : memref<1x128xf32, #tpu.memory_space<vmem>>, vector<1x128xf32>
    %3 = vector.broadcast %2 : vector<1x128xf32> to vector<8x128xf32>
    %4 = arith.mulf %1, %3 : vector<8x128xf32>
    %c0_3 = arith.constant 0 : index
    %c0_4 = arith.constant 0 : index
    %5 = vector.load %arg3[%c0_3, %c0_4] : memref<1x128xf32, #tpu.memory_space<vmem>>, vector<1x128xf32>
    %6 = vector.broadcast %5 : vector<1x128xf32> to vector<8x128xf32>
    %7 = arith.addf %4, %6 : vector<8x128xf32>
    %c0_5 = arith.constant 0 : index
    %c0_6 = arith.constant 0 : index
    %8 = vector.load %arg4[%c0_5, %c0_6] : memref<8x128xbf16, #tpu.memory_space<vmem>>, vector<8x128xbf16>
    %c0_7 = arith.constant 0 : index
    %c0_8 = arith.constant 0 : index
    %9 = vector.load %arg5[%c0_7, %c0_8] : memref<128x128xbf16, #tpu.memory_space<vmem>>, vector<128x128xbf16>
    %cst = arith.constant dense<0.000000e+00> : vector<8x128xf32>
    %10 = tpu.matmul %8, %9, %cst {dimension_numbers = #tpu.dot_dimension_numbers<[1], [0], [0], [1], [0, 0, 1, 1], [], []>} : vector<8x128xbf16>, vector<128x128xbf16>, vector<8x128xf32> -> vector<8x128xf32>
    %c0_9 = arith.constant 0 : index
    %c0_10 = arith.constant 0 : index
    %11 = vector.load %arg6[%c0_9, %c0_10] : memref<1x128xf32, #tpu.memory_space<vmem>>, vector<1x128xf32>
    %12 = vector.broadcast %11 : vector<1x128xf32> to vector<8x128xf32>
    %13 = arith.addf %10, %12 : vector<8x128xf32>
    %14 = arith.addf %7, %13 : vector<8x128xf32>
    %cst_11 = arith.constant 0.000000e+00 : f32
    %15 = vector.broadcast %cst_11 : f32 to vector<8x128xf32>
    %16 = arith.maximumf %14, %15 : vector<8x128xf32>
    %17 = arith.truncf %16 : vector<8x128xf32> to vector<8x128xbf16>
    %c0_12 = arith.constant 0 : index
    %c0_13 = arith.constant 0 : index
    %18 = vector.load %arg7[%c0_12, %c0_13] : memref<8x128xbf16, #tpu.memory_space<vmem>>, vector<8x128xbf16>
    tpu.vector_store %arg7[%c0_12, %c0_13], %17 {strides = array<i32>} : memref<8x128xbf16, #tpu.memory_space<vmem>>, vector<8x128xbf16>,
    return
  }
  func.func @transform_0(%arg0: i32) -> (i32, i32) {
    %c0_i32 = arith.constant 0 : i32
    %c0_i32_0 = arith.constant 0 : i32
    return %arg0, %c0_i32 : i32, i32
  }
  func.func @transform_1(%arg0: i32) -> (i32, i32) {
    %c0_i32 = arith.constant 0 : i32
    %c0_i32_0 = arith.constant 0 : i32
    %c0_i32_1 = arith.constant 0 : i32
    return %c0_i32, %c0_i32_0 : i32, i32
  }
  func.func @transform_2(%arg0: i32) -> (i32, i32) {
    %c0_i32 = arith.constant 0 : i32
    %c0_i32_0 = arith.constant 0 : i32
    %c0_i32_1 = arith.constant 0 : i32
    return %c0_i32, %c0_i32_0 : i32, i32
  }
  func.func @transform_3(%arg0: i32) -> (i32, i32) {
    %c0_i32 = arith.constant 0 : i32
    %c0_i32_0 = arith.constant 0 : i32
    return %arg0, %c0_i32 : i32, i32
  }
  func.func @transform_4(%arg0: i32) -> (i32, i32) {
    %c0_i32 = arith.constant 0 : i32
    %c0_i32_0 = arith.constant 0 : i32
    %c0_i32_1 = arith.constant 0 : i32
    return %c0_i32, %c0_i32_0 : i32, i32
  }
  func.func @transform_5(%arg0: i32) -> (i32, i32) {
    %c0_i32 = arith.constant 0 : i32
    %c0_i32_0 = arith.constant 0 : i32
    %c0_i32_1 = arith.constant 0 : i32
    return %c0_i32, %c0_i32_0 : i32, i32
  }
  func.func @transform_6(%arg0: i32) -> (i32, i32) {
    %c0_i32 = arith.constant 0 : i32
    %c0_i32_0 = arith.constant 0 : i32
    return %arg0, %c0_i32 : i32, i32
  }
}

</mosaic_0001>

<bundles_post_ra>
// kernel: graph_resnet_gat_forward.15
= control target key start
LH: loop header
LB: loop body
LE: loop exit
PB: predicated region body
PF: predicated region fallthrough
CT: control target
= control target key end

     0   :  { %v219_v0 = vmov 0.0   ;;  %vm220_vm0 = vmmov 0   ;;  %vm143_vm1 = vcmask 7168   ;;  %s308_s4 = inlined_call_operand.vmem [shape: f32[1,128], index: 4, kind: input, shape index: {}]   ;;  %s309_s5 = inlined_call_operand.vmem [shape: f32[1,128], index: 5, kind: input, shape index: {}]   ;;  %s310_s1 = inlined_call_operand.vmem [shape: bf16[128,128], index: 1, kind: input, shape index: {}]   ;;  %s311_s0 = inlined_call_operand.vmem [shape: f32[8,128], index: 0, kind: input, shape index: {}]   ;;  %s312_s3 = inlined_call_operand.vmem [shape: f32[1,128], index: 3, kind: input, shape index: {}]   ;;  %s313_s2 = inlined_call_operand.vmem [shape: f32[1,128], index: 2, kind: input, shape index: {}]   ;;  %s314_s6 = inlined_call_operand.vmem [shape: bf16[8,128], index: 6, kind: output, shape index: {0}]   ;;  %s315_s7 = inlined_call_operand.vmem [shape: f32[8,1], index: 7, kind: output, shape index: {1}]   ;;  %s316_s8 = inlined_call_operand.vmem [shape: f32[8,1], index: 8, kind: output, shape index: {2}]  }
   0x1   :  { %189 = vmatprep.subr.bf16.mxu0 %v219_v0  ;;  %v211_v1 = vld [vmem:[%s310_s1 + $0x38] sm:$0xff]   ;;  %205 = vmatprep.mubr.msk.bf16.mxu0 %vm220_vm0, %v219_v0  ;;  %v212_v2 = vld [vmem:[%s310_s1 + $0x30] sm:$0xff]   ;;  %v213_v3 = vld [vmem:[%s310_s1 + $0x28] sm:$0xff]  }
   0x2   :  { %190 = vmatpush3.bf16.msra.mxu0 %v211_v1  ;;  %v214_v4 = vld [vmem:[%s310_s1 + $0x20] sm:$0xff]   ;;  %v215_v5 = vld [vmem:[%s310_s1 + $0x18] sm:$0xff]   ;;  %v216_v6 = vld [vmem:[%s310_s1 + $0x10] sm:$0xff]  }
   0x3   :  { %191 = vmatprep.subr.bf16.mxu0 %v219_v0  ;;  %v217_v7 = vld [vmem:[%s310_s1 + $0x8] sm:$0xff]   ;;  %v218_v8 = vld [vmem:[%s310_s1] sm:$0xff]  }
   0x4   :  { %v27_v9 = vld [vmem:[%s311_s0] sm:$0xff] }
   0x5   :  { %v28_v10 = vpack.c.bf16 %v27_v9, %v27_v9  ;;  %v178_v11 = vld [vmem:[%s312_s3] ss:$0 sm:$0xff] }
   0x6   :  { %192 = vmatpush3.bf16.msra.mxu0 %v212_v2  ;;  %v179_v16 = vld [vmem:[%s313_s2] ss:$0 sm:$0xff] }
   0x7   :  { %193 = vmatprep.subr.bf16.mxu0 %v219_v0 }
   0xa   :  { %194 = vmatpush3.bf16.msra.mxu0 %v213_v3 }
   0xb   :  { %195 = vmatprep.subr.bf16.mxu0 %v219_v0 }
   0xe   :  { %196 = vmatpush3.bf16.msra.mxu0 %v214_v4 }
   0xf   :  { %197 = vmatprep.subr.bf16.mxu0 %v219_v0 }
  0x12   :  { %198 = vmatpush3.bf16.msra.mxu0 %v215_v5 }
  0x13   :  { %199 = vmatprep.subr.bf16.mxu0 %v219_v0 }
  0x16   :  { %200 = vmatpush3.bf16.msra.mxu0 %v216_v6 }
  0x17   :  { %201 = vmatprep.subr.bf16.mxu0 %v219_v0 }
  0x1a   :  { %202 = vmatpush3.bf16.msra.mxu0 %v217_v7 }
  0x1b   :  { %203 = vmatprep.subr.bf16.mxu0 %v219_v0 }
  0x1e   :  { %204 = vmatpush3.bf16.msra.mxu0 %v218_v8 }
  0x21   :  { %206 = vmatmul.mubr.bf16.vlgmr.msra.gmra.mxu0 %v28_v10 }
  0xe1   :  { %v127_v12 = vpop.f32.mrf.mxu0 }
  0xe2   :  { %v156_v13 = vpack.c.bf16 %v127_v12, %v127_v12  ;;  %v140_v14 = vmul.f32 %v178_v11, %v127_v12  ;;  %v152_v18 = vmul.f32 %v179_v16, %v127_v12 }
  0xe3   :  { %v207_v15 = vpop.f32.mrf.mxu0 }
  0xe4   :  { %157 = vst [vmem:[%s314_s6] sm:$0xf] %v156_v13  ;;  %141 = vadd.xlane.f32.xlu0 %v140_v14 }
  0xe5   :  { %v130_v17 = vpop.f32.mrf.mxu0 }
  0xe7   :  { %v208_v19 = vpop.f32.mrf.mxu0 }
  0xe8   :  { %153 = vadd.xlane.f32.xlu0 %v152_v18 }
 0x16d   :  { %v142_v20 = vpop.xlane.xlu0 %141 }
 0x16e   :  { %144 = vst.msk [vmem:[%s315_s7] sm:$0xff] %vm143_vm1, %v142_v20 }
 0x171   :  { %v154_v21 = vpop.xlane.xlu0 %153 }
 0x172   :  { %155 = vst.msk [vmem:[%s316_s8] sm:$0xff] %vm143_vm1, %v154_v21 }

// kernel: graph_resnet_gat_forward.16
= control target key start
LH: loop header
LB: loop body
LE: loop exit
PB: predicated region body
PF: predicated region fallthrough
CT: control target
= control target key end

     0   :  { %v235_v0 = vmov 0   ;;  %vm40_vm0 = vcmask 7168   ;;  %v236_v2 = vmov -inf   ;;  %vm73_vm3 = vcmask 64512   ;;  %s334_s3 = inlined_call_operand.vmem [shape: f32[8,1], index: 3, kind: input, shape index: {}]   ;;  %s335_s2 = inlined_call_operand.vmem [shape: bf16[8,8], index: 2, kind: input, shape index: {}]   ;;  %s336_s1 = inlined_call_operand.vmem [shape: s8[8,8], index: 1, kind: input, shape index: {}]   ;;  %s337_s5 = inlined_call_operand.<no memory space> [shape: f32[1,1], index: 5, kind: input, shape index: {}]   ;;  %s338_s4 = inlined_call_operand.vmem [shape: f32[1,8], index: 4, kind: input, shape index: {}]   ;;  %s339_s0 = inlined_call_operand.vmem [shape: bf16[8,128], index: 0, kind: input, shape index: {}]   ;;  %s340_s7 = inlined_call_operand.vmem [shape: f32[8,1], index: 7, kind: input, shape index: {}]   ;;  %s341_s6 = inlined_call_operand.vmem [shape: f32[1,128], index: 6, kind: input, shape index: {}]   ;;  %s342_s8 = inlined_call_operand.vmem [shape: bf16[8,128], index: 8, kind: output, shape index: {0}]   ;;  %s343_s9 = inlined_call_operand.vmem [shape: f32[1,128], index: 9, kind: output, shape index: {1}]   ;;  %s344_s10 = inlined_call_operand.vmem [shape: f32[1,128], index: 10, kind: output, shape index: {2}]  }
   0x1   :  { %227 = vset.pattern.permute.xlu0 %v235_v0  ;;  %v45_v1 = vld [vmem:[%s334_s3] sm:$0xff]  ;;  %228 = vset.pattern.permute.xlu1 %v235_v0  ;;  %41 = vst.msk [vmem:[#allocation2] sm:$0xff] %vm40_vm0, %v236_v2  ;;  %v61_v6 = vstv %s337_s5  ;;  %v237_v18 = vmov 0.0   ;;  %vm109_vm4 = vcmask 1043456   ;;  %vm238_vm5 = vmmov 0  }
   0x2   :  { %49 = vperm.xlu0 %227, %v45_v1   ;;  %v59_v3 = vld [vmem:[%s335_s2] sm:$0xf]  ;;  %42 = vst.msk [vmem:[#allocation3] sm:$0xff] %vm40_vm0, %v237_v18  ;;  %217 = vmatprep.subr.bf16.mxu0 %v237_v18 }
   0x3   :  { %v66_v4 = vld [vmem:[%s336_s1] sm:$0x3]  ;;  %v60_v5 = vunpack.c.l.bf16 %v59_v3  ;;  %219 = vmatprep.mubr.msk.bf16.mxu0 %vm238_vm5, %v237_v18 }
   0x4   :  { %vm67_vm1 = vnez %v66_v4  ;;  %v212_v7 = vld [vmem:[%s338_s4] ss:$0 sm:$0xff] }
   0x5   :  { %v62_v8 = vmul.f32 %v61_v6, %v60_v5  ;;  %v68_v9 = vsel %vm67_vm1, 16843009, %v235_v0  ;;  %v105_v24 = vld [vmem:[%s339_s0] sm:$0xf] }
   0x6   :  { %v69_v12 = vunpack.c.0.s8 %v68_v9  ;;  %v111_v25 = vsel %vm109_vm4, %v105_v24, 0  ;;  %v178_v27 = vld [vmem:[%s340_s7] sm:$0xff] }
   0x7   :  { %218 = vmatpush3.bf16.msra.mxu0 %v111_v25  ;;  %v214_v47 = vld [vmem:[%s341_s6] ss:$0 sm:$0xff] }
   0x8   :  { %vm70_vm2 = vcmp.ne.s32.totalorder %v69_v12, 0  ;;  %v72_v19 = vld [vmem:[#allocation2] sm:$0xff] }
   0x9   :  { %v89_v34 = vld [vmem:[#allocation3] sm:$0xff] }
  0x7d   :  { %v50_v10 = vpop.permute.xlu0 %49 }
  0x7e   :  { %v58_v11 = vadd.f32 %v212_v7, %v50_v10 }
  0x80   :  { %v63_v13 = vadd.f32 %v62_v8, %v58_v11 }
  0x82   :  { %v64_v14 = vmul.f32 0.2, %v63_v13 }
  0x84   :  { %v65_v15 = vmax.f32 %v63_v13, %v64_v14 }
  0x86   :  { %v71_v16 = vsel %vm70_vm2, %v65_v15, -1e+30 }
  0x87   :  { %v74_v17 = vsel %vm73_vm3, %v71_v16, -inf }
  0x88   :  { %75 = vmax.xlane.f32.xlu0 %v74_v17 }
 0x111   :  { %v76_v20 = vpop.xlane.xlu0 %75 }
 0x112   :  { %v77_v21 = vmax.f32 %v72_v19, %v76_v20 }
 0x114   :  { %v78_v22 = vsub.f32 %v72_v19, %v77_v21  ;;  %155 = vst.msk [vmem:[#allocation2] sm:$0xff] %vm40_vm0, %v77_v21  ;;  %83 = vperm.xlu1 %228, %v77_v21  }
 0x116   :  { %v79_v23 = vmul.f32 1.442695, %v78_v22 }
 0x118   :  { %229 = vpow2.f32 %v79_v23 }
 0x125   :  { %v230_v26 = vpop.eup %229 }
 0x126   :  { %100 = vperm.xlu0 %227, %v230_v26   ;;  %v90_v35 = vmul.f32 %v230_v26, %v89_v34 }
 0x12a   :  { %181 = vperm.xlu0 %227, %v178_v27  }
 0x18f   :  { %v84_v28 = vpop.permute.xlu1 %83 }
 0x190   :  { %v86_v29 = vsub.f32 %v71_v16, %v84_v28 }
 0x192   :  { %v87_v30 = vmul.f32 1.442695, %v86_v29 }
 0x194   :  { %231 = vpow2.f32 %v87_v30 }
 0x1a1   :  { %v232_v31 = vpop.eup %231  ;;  %v101_v44 = vpop.permute.xlu0 %100 }
 0x1a2   :  { %v91_v32 = vsel %vm73_vm3, %v232_v31, 0.0  ;;  %v104_v33 = vpack.c.bf16 %v232_v31, %v232_v31  ;;  %v103_v45 = vmul.f32 0.0, %v101_v44 }
 0x1a3   :  { %92 = vadd.xlane.f32.xlu1 %v91_v32 }
 0x1a4   :  { %220 = vmatmul.mubr.msk.bf16.vlgmr.msra.gmra.mxu0 %vm73_vm3, %v104_v33 }
 0x1a5   :  { %v182_v51 = vpop.permute.xlu0 %181 }
 0x22c   :  { %v93_v36 = vpop.xlane.xlu1 %92 }
 0x22d   :  { %v94_v37 = vadd.f32 %v93_v36, %v90_v35 }
 0x22f   :  { %96 = vst.msk [vmem:[#allocation3] sm:$0xff] %vm40_vm0, %v94_v37 }
 0x236   :  { %v160_v38 = vld [vmem:[#allocation3] sm:$0xff] }
 0x237   :  { %233 = vrcp.f32 %v160_v38 }
 0x244   :  { %v234_v39 = vpop.eup %233 }
 0x245   :  { %164 = vperm.xlu1 %228, %v234_v39  }
 0x264   :  { %v147_v40 = vpop.f32.mrf.mxu0 }
 0x265   :  { %v153_v46 = vadd.f32 %v147_v40, %v103_v45 }
 0x266   :  { %v221_v41 = vpop.f32.mrf.mxu0 }
 0x268   :  { %v150_v42 = vpop.f32.mrf.mxu0 }
 0x26a   :  { %v222_v43 = vpop.f32.mrf.mxu0 }
 0x2c0   :  { %v165_v48 = vpop.permute.xlu1 %164 }
 0x2c1   :  { %v167_v49 = vmul.f32 %v165_v48, %v153_v46 }
 0x2c3   :  { %v175_v50 = vadd.f32 %v214_v47, %v167_v49 }
 0x2c5   :  { %v176_v52 = vpack.c.bf16 %v175_v50, %v175_v50  ;;  %v184_v53 = vmul.f32 %v182_v51, %v175_v50 }
 0x2c7   :  { %177 = vst [vmem:[%s342_s8] sm:$0xf] %v176_v52  ;;  %v185_v54 = vrot.slane %v184_v53, 4  ;;  %v192_v55 = vmul.f32 %v184_v53, %v184_v53 }
 0x2c9   :  { %v186_v56 = vadd.f32 %v185_v54, %v184_v53  ;;  %v193_v57 = vrot.slane %v192_v55, 4 }
 0x2cb   :  { %v187_v58 = vrot.slane %v186_v56, 2  ;;  %v194_v59 = vadd.f32 %v193_v57, %v192_v55 }
 0x2cd   :  { %v188_v60 = vadd.f32 %v187_v58, %v186_v56  ;;  %v195_v61 = vrot.slane %v194_v59, 2 }
 0x2cf   :  { %v189_v62 = vrot.slane %v188_v60, 1  ;;  %v196_v63 = vadd.f32 %v195_v61, %v194_v59 }
 0x2d1   :  { %v190_v0 = vadd.f32 %v189_v62, %v188_v60  ;;  %v197_v1 = vrot.slane %v196_v63, 1 }
 0x2d3   :  { %191 = vst [vmem:[%s343_s9] sm:$0x1] %v190_v0  ;;  %v198_v2 = vadd.f32 %v197_v1, %v196_v63 }
 0x2d5   :  { %199 = vst [vmem:[%s344_s10] sm:$0x1] %v198_v2 }

// kernel: graph_resnet_gat_forward.19
= control target key start
LH: loop header
LB: loop body
LE: loop exit
PB: predicated region body
PF: predicated region fallthrough
CT: control target
= control target key end

     0   :  { %v213_v0 = vmov 0.0   ;;  %vm214_vm0 = vmmov 0   ;;  %s292_s4 = inlined_call_operand.vmem [shape: bf16[128,128], index: 4, kind: input, shape index: {}]   ;;  %s293_s3 = inlined_call_operand.vmem [shape: f32[8,128], index: 3, kind: input, shape index: {}]   ;;  %s294_s0 = inlined_call_operand.vmem [shape: bf16[8,128], index: 0, kind: input, shape index: {}]   ;;  %s295_s1 = inlined_call_operand.vmem [shape: f32[1,128], index: 1, kind: input, shape index: {}]   ;;  %s296_s2 = inlined_call_operand.vmem [shape: f32[1,128], index: 2, kind: input, shape index: {}]   ;;  %s297_s5 = inlined_call_operand.vmem [shape: f32[1,128], index: 5, kind: input, shape index: {}]   ;;  %s298_s6 = inlined_call_operand.vmem [shape: bf16[8,128], index: 6, kind: output, shape index: {}]  }
   0x1   :  { %183 = vmatprep.subr.bf16.mxu0 %v213_v0  ;;  %v205_v1 = vld [vmem:[%s292_s4 + $0x38] sm:$0xff]   ;;  %199 = vmatprep.mubr.msk.bf16.mxu0 %vm214_vm0, %v213_v0  ;;  %v206_v2 = vld [vmem:[%s292_s4 + $0x30] sm:$0xff]   ;;  %v207_v3 = vld [vmem:[%s292_s4 + $0x28] sm:$0xff]  }
   0x2   :  { %184 = vmatpush3.bf16.msra.mxu0 %v205_v1  ;;  %v208_v4 = vld [vmem:[%s292_s4 + $0x20] sm:$0xff]   ;;  %v209_v5 = vld [vmem:[%s292_s4 + $0x18] sm:$0xff]   ;;  %v210_v6 = vld [vmem:[%s292_s4 + $0x10] sm:$0xff]  }
   0x3   :  { %185 = vmatprep.subr.bf16.mxu0 %v213_v0  ;;  %v211_v7 = vld [vmem:[%s292_s4 + $0x8] sm:$0xff]   ;;  %v212_v8 = vld [vmem:[%s292_s4] sm:$0xff]  }
   0x4   :  { %v42_v9 = vld [vmem:[%s293_s3] sm:$0xff] }
   0x5   :  { %v43_v10 = vpack.c.bf16 %v42_v9, %v42_v9  ;;  %v24_v11 = vld [vmem:[%s294_s0] sm:$0xf] }
   0x6   :  { %186 = vmatpush3.bf16.msra.mxu0 %v206_v2  ;;  %v25_v12 = vunpack.c.l.bf16 %v24_v11  ;;  %v163_v13 = vld [vmem:[%s295_s1] ss:$0 sm:$0xff] }
   0x7   :  { %187 = vmatprep.subr.bf16.mxu0 %v213_v0  ;;  %v164_v15 = vld [vmem:[%s296_s2] ss:$0 sm:$0xff] }
   0x8   :  { %v33_v14 = vmul.f32 %v163_v13, %v25_v12  ;;  %v165_v16 = vld [vmem:[%s297_s5] ss:$0 sm:$0xff] }
   0xa   :  { %188 = vmatpush3.bf16.msra.mxu0 %v207_v3  ;;  %v41_v17 = vadd.f32 %v164_v15, %v33_v14 }
   0xb   :  { %189 = vmatprep.subr.bf16.mxu0 %v213_v0 }
   0xe   :  { %190 = vmatpush3.bf16.msra.mxu0 %v208_v4 }
   0xf   :  { %191 = vmatprep.subr.bf16.mxu0 %v213_v0 }
  0x12   :  { %192 = vmatpush3.bf16.msra.mxu0 %v209_v5 }
  0x13   :  { %193 = vmatprep.subr.bf16.mxu0 %v213_v0 }
  0x16   :  { %194 = vmatpush3.bf16.msra.mxu0 %v210_v6 }
  0x17   :  { %195 = vmatprep.subr.bf16.mxu0 %v213_v0 }
  0x1a   :  { %196 = vmatpush3.bf16.msra.mxu0 %v211_v7 }
  0x1b   :  { %197 = vmatprep.subr.bf16.mxu0 %v213_v0 }
  0x1e   :  { %198 = vmatpush3.bf16.msra.mxu0 %v212_v8 }
  0x21   :  { %200 = vmatmul.mubr.bf16.vlgmr.msra.gmra.mxu0 %v43_v10 }
  0xe1   :  { %v149_v18 = vpop.f32.mrf.mxu0 }
  0xe2   :  { %v150_v19 = vadd.f32 %v165_v16, %v149_v18 }
  0xe3   :  { %v201_v20 = vpop.f32.mrf.mxu0 }
  0xe4   :  { %v155_v21 = vadd.f32 %v150_v19, %v41_v17 }
  0xe5   :  { %v152_v22 = vpop.f32.mrf.mxu0 }
  0xe6   :  { %v156_v23 = vmax.f32 %v155_v21, 0.0 }
  0xe7   :  { %v202_v24 = vpop.f32.mrf.mxu0 }
  0xe8   :  { %v157_v25 = vpack.c.bf16 %v156_v23, %v156_v23 }
  0xea   :  { %158 = vst [vmem:[%s298_s6] sm:$0xf] %v157_v25 }

// kernel: graph_resnet_gat_forward.17
= control target key start
LH: loop header
LB: loop body
LE: loop exit
PB: predicated region body
PF: predicated region fallthrough
CT: control target
= control target key end

     0   :  { %v239_v0 = vmov 0.0   ;;  %vm240_vm0 = vmmov 0   ;;  %vm161_vm1 = vcmask 7168   ;;  %s334_s1 = inlined_call_operand.vmem [shape: bf16[128,128], index: 1, kind: input, shape index: {}]   ;;  %s335_s0 = inlined_call_operand.vmem [shape: bf16[8,128], index: 0, kind: input, shape index: {}]   ;;  %s336_s4 = inlined_call_operand.vmem [shape: f32[1,128], index: 4, kind: input, shape index: {}]   ;;  %s337_s5 = inlined_call_operand.vmem [shape: f32[1,128], index: 5, kind: input, shape index: {}]   ;;  %s338_s3 = inlined_call_operand.vmem [shape: f32[1,128], index: 3, kind: input, shape index: {}]   ;;  %s339_s2 = inlined_call_operand.vmem [shape: f32[1,128], index: 2, kind: input, shape index: {}]   ;;  %s340_s6 = inlined_call_operand.vmem [shape: bf16[8,128], index: 6, kind: output, shape index: {0}]   ;;  %s341_s7 = inlined_call_operand.vmem [shape: f32[8,1], index: 7, kind: output, shape index: {1}]   ;;  %s342_s8 = inlined_call_operand.vmem [shape: f32[8,1], index: 8, kind: output, shape index: {2}]  }
   0x1   :  { %209 = vmatprep.subr.bf16.mxu0 %v239_v0  ;;  %v231_v1 = vld [vmem:[%s334_s1 + $0x38] sm:$0xff]   ;;  %225 = vmatprep.mubr.msk.bf16.mxu0 %vm240_vm0, %v239_v0  ;;  %v232_v2 = vld [vmem:[%s334_s1 + $0x30] sm:$0xff]   ;;  %v233_v3 = vld [vmem:[%s334_s1 + $0x28] sm:$0xff]  }
   0x2   :  { %210 = vmatpush3.bf16.msra.mxu0 %v231_v1  ;;  %v234_v4 = vld [vmem:[%s334_s1 + $0x20] sm:$0xff]   ;;  %v235_v7 = vld [vmem:[%s334_s1 + $0x18] sm:$0xff]   ;;  %v236_v10 = vld [vmem:[%s334_s1 + $0x10] sm:$0xff]  }
   0x3   :  { %211 = vmatprep.subr.bf16.mxu0 %v239_v0  ;;  %v27_v5 = vld [vmem:[%s335_s0] sm:$0xf]  ;;  %v237_v13 = vld [vmem:[%s334_s1 + $0x8] sm:$0xff]  }
   0x4   :  { %v28_v6 = vunpack.c.l.bf16 %v27_v5  ;;  %v188_v8 = vld [vmem:[%s336_s4] ss:$0 sm:$0xff] }
   0x5   :  { %v189_v11 = vld [vmem:[%s337_s5] ss:$0 sm:$0xff] }
   0x6   :  { %212 = vmatpush3.bf16.msra.mxu0 %v232_v2  ;;  %v36_v9 = vmul.f32 %v188_v8, %v28_v6  ;;  %v238_v15 = vld [vmem:[%s334_s1] sm:$0xff]  }
   0x7   :  { %213 = vmatprep.subr.bf16.mxu0 %v239_v0  ;;  %v198_v17 = vld [vmem:[%s338_s3] ss:$0 sm:$0xff] }
   0x8   :  { %v44_v12 = vadd.f32 %v189_v11, %v36_v9  ;;  %v199_v22 = vld [vmem:[%s339_s2] ss:$0 sm:$0xff] }
   0xa   :  { %214 = vmatpush3.bf16.msra.mxu0 %v233_v3  ;;  %v45_v14 = vmax.f32 %v44_v12, 0.0 }
   0xb   :  { %215 = vmatprep.subr.bf16.mxu0 %v239_v0 }
   0xc   :  { %v46_v16 = vpack.c.bf16 %v45_v14, %v45_v14 }
   0xe   :  { %216 = vmatpush3.bf16.msra.mxu0 %v234_v4 }
   0xf   :  { %217 = vmatprep.subr.bf16.mxu0 %v239_v0 }
  0x12   :  { %218 = vmatpush3.bf16.msra.mxu0 %v235_v7 }
  0x13   :  { %219 = vmatprep.subr.bf16.mxu0 %v239_v0 }
  0x16   :  { %220 = vmatpush3.bf16.msra.mxu0 %v236_v10 }
  0x17   :  { %221 = vmatprep.subr.bf16.mxu0 %v239_v0 }
  0x1a   :  { %222 = vmatpush3.bf16.msra.mxu0 %v237_v13 }
  0x1b   :  { %223 = vmatprep.subr.bf16.mxu0 %v239_v0 }
  0x1e   :  { %224 = vmatpush3.bf16.msra.mxu0 %v238_v15 }
  0x21   :  { %226 = vmatmul.mubr.bf16.vlgmr.msra.gmra.mxu0 %v46_v16 }
  0xe1   :  { %v145_v18 = vpop.f32.mrf.mxu0 }
  0xe2   :  { %v174_v19 = vpack.c.bf16 %v145_v18, %v145_v18  ;;  %v158_v20 = vmul.f32 %v198_v17, %v145_v18  ;;  %v170_v24 = vmul.f32 %v199_v22, %v145_v18 }
  0xe3   :  { %v227_v21 = vpop.f32.mrf.mxu0 }
  0xe4   :  { %175 = vst [vmem:[%s340_s6] sm:$0xf] %v174_v19  ;;  %159 = vadd.xlane.f32.xlu0 %v158_v20 }
  0xe5   :  { %v148_v23 = vpop.f32.mrf.mxu0 }
  0xe7   :  { %v228_v25 = vpop.f32.mrf.mxu0 }
  0xe8   :  { %171 = vadd.xlane.f32.xlu0 %v170_v24 }
 0x16d   :  { %v160_v26 = vpop.xlane.xlu0 %159 }
 0x16e   :  { %162 = vst.msk [vmem:[%s341_s7] sm:$0xff] %vm161_vm1, %v160_v26 }
 0x171   :  { %v172_v27 = vpop.xlane.xlu0 %171 }
 0x172   :  { %173 = vst.msk [vmem:[%s342_s8] sm:$0xff] %vm161_vm1, %v172_v27 }

// kernel: graph_resnet_gat_forward.20
= control target key start
LH: loop header
LB: loop body
LE: loop exit
PB: predicated region body
PF: predicated region fallthrough
CT: control target
= control target key end

     0   :  { %v218_v0 = vmov 0.0   ;;  %vm219_vm0 = vmmov 0   ;;  %vm142_vm1 = vcmask 7168   ;;  %s307_s4 = inlined_call_operand.vmem [shape: f32[1,128], index: 4, kind: input, shape index: {}]   ;;  %s308_s5 = inlined_call_operand.vmem [shape: f32[1,128], index: 5, kind: input, shape index: {}]   ;;  %s309_s1 = inlined_call_operand.vmem [shape: bf16[128,128], index: 1, kind: input, shape index: {}]   ;;  %s310_s0 = inlined_call_operand.vmem [shape: bf16[8,128], index: 0, kind: input, shape index: {}]   ;;  %s311_s3 = inlined_call_operand.vmem [shape: f32[1,128], index: 3, kind: input, shape index: {}]   ;;  %s312_s2 = inlined_call_operand.vmem [shape: f32[1,128], index: 2, kind: input, shape index: {}]   ;;  %s313_s6 = inlined_call_operand.vmem [shape: bf16[8,128], index: 6, kind: output, shape index: {0}]   ;;  %s314_s7 = inlined_call_operand.vmem [shape: f32[8,1], index: 7, kind: output, shape index: {1}]   ;;  %s315_s8 = inlined_call_operand.vmem [shape: f32[8,1], index: 8, kind: output, shape index: {2}]  }
   0x1   :  { %188 = vmatprep.subr.bf16.mxu0 %v218_v0  ;;  %v210_v1 = vld [vmem:[%s309_s1 + $0x38] sm:$0xff]   ;;  %204 = vmatprep.mubr.msk.bf16.mxu0 %vm219_vm0, %v218_v0  ;;  %v211_v2 = vld [vmem:[%s309_s1 + $0x30] sm:$0xff]   ;;  %v212_v3 = vld [vmem:[%s309_s1 + $0x28] sm:$0xff]  }
   0x2   :  { %189 = vmatpush3.bf16.msra.mxu0 %v210_v1  ;;  %v213_v4 = vld [vmem:[%s309_s1 + $0x20] sm:$0xff]   ;;  %v214_v5 = vld [vmem:[%s309_s1 + $0x18] sm:$0xff]   ;;  %v215_v6 = vld [vmem:[%s309_s1 + $0x10] sm:$0xff]  }
   0x3   :  { %190 = vmatprep.subr.bf16.mxu0 %v218_v0  ;;  %v216_v7 = vld [vmem:[%s309_s1 + $0x8] sm:$0xff]   ;;  %v217_v8 = vld [vmem:[%s309_s1] sm:$0xff]  }
   0x4   :  { %v27_v9 = vld [vmem:[%s310_s0] sm:$0xf] }
   0x5   :  { %v177_v10 = vld [vmem:[%s311_s3] ss:$0 sm:$0xff] }
   0x6   :  { %191 = vmatpush3.bf16.msra.mxu0 %v211_v2  ;;  %v178_v15 = vld [vmem:[%s312_s2] ss:$0 sm:$0xff] }
   0x7   :  { %192 = vmatprep.subr.bf16.mxu0 %v218_v0 }
   0xa   :  { %193 = vmatpush3.bf16.msra.mxu0 %v212_v3 }
   0xb   :  { %194 = vmatprep.subr.bf16.mxu0 %v218_v0 }
   0xe   :  { %195 = vmatpush3.bf16.msra.mxu0 %v213_v4 }
   0xf   :  { %196 = vmatprep.subr.bf16.mxu0 %v218_v0 }
  0x12   :  { %197 = vmatpush3.bf16.msra.mxu0 %v214_v5 }
  0x13   :  { %198 = vmatprep.subr.bf16.mxu0 %v218_v0 }
  0x16   :  { %199 = vmatpush3.bf16.msra.mxu0 %v215_v6 }
  0x17   :  { %200 = vmatprep.subr.bf16.mxu0 %v218_v0 }
  0x1a   :  { %201 = vmatpush3.bf16.msra.mxu0 %v216_v7 }
  0x1b   :  { %202 = vmatprep.subr.bf16.mxu0 %v218_v0 }
  0x1e   :  { %203 = vmatpush3.bf16.msra.mxu0 %v217_v8 }
  0x21   :  { %205 = vmatmul.mubr.bf16.vlgmr.msra.gmra.mxu0 %v27_v9 }
  0xe1   :  { %v126_v11 = vpop.f32.mrf.mxu0 }
  0xe2   :  { %v155_v12 = vpack.c.bf16 %v126_v11, %v126_v11  ;;  %v139_v13 = vmul.f32 %v177_v10, %v126_v11  ;;  %v151_v17 = vmul.f32 %v178_v15, %v126_v11 }
  0xe3   :  { %v206_v14 = vpop.f32.mrf.mxu0 }
  0xe4   :  { %156 = vst [vmem:[%s313_s6] sm:$0xf] %v155_v12  ;;  %140 = vadd.xlane.f32.xlu0 %v139_v13 }
  0xe5   :  { %v129_v16 = vpop.f32.mrf.mxu0 }
  0xe7   :  { %v207_v18 = vpop.f32.mrf.mxu0 }
  0xe8   :  { %152 = vadd.xlane.f32.xlu0 %v151_v17 }
 0x16d   :  { %v141_v19 = vpop.xlane.xlu0 %140 }
 0x16e   :  { %143 = vst.msk [vmem:[%s314_s7] sm:$0xff] %vm142_vm1, %v141_v19 }
 0x171   :  { %v153_v20 = vpop.xlane.xlu0 %152 }
 0x172   :  { %154 = vst.msk [vmem:[%s315_s8] sm:$0xff] %vm142_vm1, %v153_v20 }

// kernel: graph_resnet_gat_forward.24
= control target key start
LH: loop header
LB: loop body
LE: loop exit
PB: predicated region body
PF: predicated region fallthrough
CT: control target
= control target key end

     0   :  { %s87_s0 = inlined_call_operand.vmem [shape: bf16[8,128], index: 0, kind: input, shape index: {}]   ;;  %s88_s1 = inlined_call_operand.vmem [shape: f32[1,128], index: 1, kind: input, shape index: {}]   ;;  %s89_s2 = inlined_call_operand.vmem [shape: f32[1,128], index: 2, kind: input, shape index: {}]   ;;  %s90_s3 = inlined_call_operand.vmem [shape: bf16[8,128], index: 3, kind: input, shape index: {}]   ;;  %s91_s4 = inlined_call_operand.vmem [shape: bf16[8,128], index: 4, kind: output, shape index: {}]  }
   0x1   :  { %v17_v0 = vld [vmem:[%s87_s0] sm:$0xf] }
   0x2   :  { %v45_v1 = vld [vmem:[%s88_s1] ss:$0 sm:$0xff]  ;;  %v18_v2 = vunpack.c.l.bf16 %v17_v0 }
   0x3   :  { %v35_v3 = vld [vmem:[%s90_s3] sm:$0xf] }
   0x4   :  { %v46_v4 = vld [vmem:[%s89_s2] ss:$0 sm:$0xff]  ;;  %v26_v5 = vmul.f32 %v45_v1, %v18_v2  ;;  %v36_v6 = vunpack.c.l.bf16 %v35_v3 }
   0x6   :  { %v34_v7 = vadd.f32 %v46_v4, %v26_v5 }
   0x8   :  { %v37_v8 = vadd.f32 %v36_v6, %v34_v7 }
   0xa   :  { %v38_v9 = vmax.f32 %v37_v8, 0.0 }
   0xc   :  { %v39_v10 = vpack.c.bf16 %v38_v9, %v38_v9 }
   0xe   :  { %40 = vst [vmem:[%s91_s4] sm:$0xf] %v39_v10 }

// kernel: graph_resnet_gat_forward.29
= control target key start
LH: loop header
LB: loop body
LE: loop exit
PB: predicated region body
PF: predicated region fallthrough
CT: control target
= control target key end

     0   :  { %v212_v0 = vmov 0.0   ;;  %vm213_vm0 = vmmov 0   ;;  %s291_s4 = inlined_call_operand.vmem [shape: bf16[128,128], index: 4, kind: input, shape index: {}]   ;;  %s292_s3 = inlined_call_operand.vmem [shape: bf16[8,128], index: 3, kind: input, shape index: {}]   ;;  %s293_s0 = inlined_call_operand.vmem [shape: bf16[8,128], index: 0, kind: input, shape index: {}]   ;;  %s294_s1 = inlined_call_operand.vmem [shape: f32[1,128], index: 1, kind: input, shape index: {}]   ;;  %s295_s2 = inlined_call_operand.vmem [shape: f32[1,128], index: 2, kind: input, shape index: {}]   ;;  %s296_s5 = inlined_call_operand.vmem [shape: f32[1,128], index: 5, kind: input, shape index: {}]   ;;  %s297_s6 = inlined_call_operand.vmem [shape: bf16[8,128], index: 6, kind: output, shape index: {}]  }
   0x1   :  { %182 = vmatprep.subr.bf16.mxu0 %v212_v0  ;;  %v204_v1 = vld [vmem:[%s291_s4 + $0x38] sm:$0xff]   ;;  %198 = vmatprep.mubr.msk.bf16.mxu0 %vm213_vm0, %v212_v0  ;;  %v205_v2 = vld [vmem:[%s291_s4 + $0x30] sm:$0xff]   ;;  %v206_v3 = vld [vmem:[%s291_s4 + $0x28] sm:$0xff]  }
   0x2   :  { %183 = vmatpush3.bf16.msra.mxu0 %v204_v1  ;;  %v207_v4 = vld [vmem:[%s291_s4 + $0x20] sm:$0xff]   ;;  %v208_v5 = vld [vmem:[%s291_s4 + $0x18] sm:$0xff]   ;;  %v209_v6 = vld [vmem:[%s291_s4 + $0x10] sm:$0xff]  }
   0x3   :  { %184 = vmatprep.subr.bf16.mxu0 %v212_v0  ;;  %v210_v7 = vld [vmem:[%s291_s4 + $0x8] sm:$0xff]   ;;  %v211_v8 = vld [vmem:[%s291_s4] sm:$0xff]  }
   0x4   :  { %v42_v9 = vld [vmem:[%s292_s3] sm:$0xf] }
   0x5   :  { %v24_v10 = vld [vmem:[%s293_s0] sm:$0xf] }
   0x6   :  { %185 = vmatpush3.bf16.msra.mxu0 %v205_v2  ;;  %v25_v11 = vunpack.c.l.bf16 %v24_v10  ;;  %v162_v12 = vld [vmem:[%s294_s1] ss:$0 sm:$0xff] }
   0x7   :  { %186 = vmatprep.subr.bf16.mxu0 %v212_v0  ;;  %v163_v14 = vld [vmem:[%s295_s2] ss:$0 sm:$0xff] }
   0x8   :  { %v33_v13 = vmul.f32 %v162_v12, %v25_v11  ;;  %v164_v15 = vld [vmem:[%s296_s5] ss:$0 sm:$0xff] }
   0xa   :  { %187 = vmatpush3.bf16.msra.mxu0 %v206_v3  ;;  %v41_v16 = vadd.f32 %v163_v14, %v33_v13 }
   0xb   :  { %188 = vmatprep.subr.bf16.mxu0 %v212_v0 }
   0xe   :  { %189 = vmatpush3.bf16.msra.mxu0 %v207_v4 }
   0xf   :  { %190 = vmatprep.subr.bf16.mxu0 %v212_v0 }
  0x12   :  { %191 = vmatpush3.bf16.msra.mxu0 %v208_v5 }
  0x13   :  { %192 = vmatprep.subr.bf16.mxu0 %v212_v0 }
  0x16   :  { %193 = vmatpush3.bf16.msra.mxu0 %v209_v6 }
  0x17   :  { %194 = vmatprep.subr.bf16.mxu0 %v212_v0 }
  0x1a   :  { %195 = vmatpush3.bf16.msra.mxu0 %v210_v7 }
  0x1b   :  { %196 = vmatprep.subr.bf16.mxu0 %v212_v0 }
  0x1e   :  { %197 = vmatpush3.bf16.msra.mxu0 %v211_v8 }
  0x21   :  { %199 = vmatmul.mubr.bf16.vlgmr.msra.gmra.mxu0 %v42_v9 }
  0xe1   :  { %v148_v17 = vpop.f32.mrf.mxu0 }
  0xe2   :  { %v149_v18 = vadd.f32 %v164_v15, %v148_v17 }
  0xe3   :  { %v200_v19 = vpop.f32.mrf.mxu0 }
  0xe4   :  { %v154_v20 = vadd.f32 %v149_v18, %v41_v16 }
  0xe5   :  { %v151_v21 = vpop.f32.mrf.mxu0 }
  0xe6   :  { %v155_v22 = vmax.f32 %v154_v20, 0.0 }
  0xe7   :  { %v201_v23 = vpop.f32.mrf.mxu0 }
  0xe8   :  { %v156_v24 = vpack.c.bf16 %v155_v22, %v155_v22 }
  0xea   :  { %157 = vst [vmem:[%s297_s6] sm:$0xf] %v156_v24 }

</bundles_post_ra>
